<compile_context>
chip_gen: v7x
topology: tpu7x:2x2x1
jax: 0.10.0
libtpu: 0.0.40
codegen_flags: <defaults>
</compile_context>

<pallas_src>
import jax
import jax.numpy as jnp
from jax.experimental import pallas as pl
from jax.experimental.pallas import tpu as pltpu


def _add_bias_kernel(x_ref, b_ref, o_ref):
    # Broadcasted elementwise add (bias has size-1 dims everywhere except C).
    # The broadcast lands on VPU/XLU slots with full slack in a mem-bound kernel.
    o_ref[...] = x_ref[...] + b_ref[...]


def _sublane_align(dtype):
    """Sublane alignment for packed dtypes: 8 (f32), 16 (bf16), 32 (int8/fp8)."""
    return max(8, 32 // jnp.dtype(dtype).itemsize)


def _target_block_bytes():
    """Per-input-block byte budget.

    ~2 MiB hits ~85% of HBM roofline on v6e and keeps total resident VMEM
    (in + out, double-buffered, + bias) around 8-10 MiB — safely under v5e's
    16 MiB default scoped VMEM.  v7x (64 MiB physical VMEM, ~3.2 TB/s HBM)
    benefits from ~4 MiB blocks; it is detected by its smaller VMEM capacity.
    """
    try:
        vmem = pltpu.get_tpu_info().vmem_capacity_bytes
        if vmem <= (64 << 20):
            return 4 << 20
    except Exception:
        pass
    return 2 << 20


def _add_bias_2d(x, bias_row, target_bytes):
    # x: (N, C), bias_row: (1, C)
    N, C = x.shape
    itemsize = x.dtype.itemsize

    # Lane axis: prefer the full C (contiguous slab DMA, grid-invariant bias).
    if C * itemsize <= target_bytes or C <= 128:
        TC = C
    else:
        TC = max(128, (target_bytes // itemsize) // 128 * 128)
        TC = min(TC, (C // 128) * 128)

    # Row (sublane) axis: largest aligned tile within the byte budget.
    align = _sublane_align(x.dtype)
    row_bytes = TC * itemsize
    if N * row_bytes <= target_bytes or N <= align:
        TN = N
    else:
        TN = max(align, (target_bytes // row_bytes) // align * align)

    grid = (pl.cdiv(N, TN), pl.cdiv(C, TC))
    # TODO(synk): on v7x, mark the leading grid axis pltpu.CORE_PARALLEL
    # (2 TensorCores/chip) once reliable generation detection is wired in;
    # plain "parallel" is kept here for portability across v5e/v6e/v7x.
    return pl.pallas_call(
        _add_bias_kernel,
        out_shape=jax.ShapeDtypeStruct((N, C), x.dtype),
        grid=grid,
        in_specs=[
            pl.BlockSpec((TN, TC), lambda i, j: (i, j)),
            # Grid-invariant whenever TC == C (single j step): DMA'd once.
            pl.BlockSpec((1, TC), lambda i, j: (0, j)),
        ],
        out_specs=pl.BlockSpec((TN, TC), lambda i, j: (i, j)),
        compiler_params=pltpu.CompilerParams(
            dimension_semantics=("parallel", "parallel")
        ),
    )(x, bias_row)


def _add_bias_3d(x3, bias_3d, target_bytes):
    # Lane-dense 4-D path: x3: (N, C, L=H*W), bias_3d: (1, C, 1)
    N, C, L = x3.shape
    itemsize = x3.dtype.itemsize

    # Lane axis: prefer the full H*W (contiguous, unmasked stores).
    if L * itemsize <= target_bytes or L <= 128:
        TL = L
    else:
        TL = max(128, (target_bytes // itemsize) // 128 * 128)
        TL = min(TL, (L // 128) * 128)

    # Channel (sublane) axis: full C if it fits, else aligned tile.
    align = _sublane_align(x3.dtype)
    row_bytes = TL * itemsize
    if C * row_bytes <= target_bytes or C <= align:
        TC = C
    else:
        TC = max(align, (target_bytes // row_bytes) // align * align)

    # Adaptive leading block dim (was hard-coded 1): pack batches into the
    # block until the byte budget is reached.
    plane_bytes = TC * TL * itemsize
    TB = int(max(1, min(N, target_bytes // plane_bytes)))

    grid = (pl.cdiv(N, TB), pl.cdiv(C, TC), pl.cdiv(L, TL))
    return pl.pallas_call(
        _add_bias_kernel,
        out_shape=jax.ShapeDtypeStruct((N, C, L), x3.dtype),
        grid=grid,
        in_specs=[
            pl.BlockSpec((TB, TC, TL), lambda n, c, l: (n, c, l)),
            # Grid-invariant whenever TC == C (single c step): DMA'd once.
            pl.BlockSpec((1, TC, 1), lambda n, c, l: (0, c, 0)),
        ],
        out_specs=pl.BlockSpec((TB, TC, TL), lambda n, c, l: (n, c, l)),
        compiler_params=pltpu.CompilerParams(
            dimension_semantics=("parallel", "parallel", "parallel")
        ),
    )(x3, bias_3d)


class AddBias:
    """JAX/Pallas port of the PyTorch AddBias module."""

    def __init__(self, bias):
        # bias: (C,) -> stored as (C, 1), same as nn.Parameter(bias.unsqueeze(1))
        self._bias = jnp.asarray(bias).reshape(-1, 1)

    def __call__(self, x):
        assert x.ndim in (2, 4), "AddBias expects a 2-D (N, C) or 4-D (N, C, H, W) input"
        C = self._bias.shape[0]
        # Compute in x.dtype (documented deviation from PyTorch type promotion
        # when x is lower precision than the stored bias).
        b = self._bias.astype(x.dtype)
        total_bytes = x.size * x.dtype.itemsize
        target = _target_block_bytes()

        if x.ndim == 2:
            # Fast path: tiny arrays, or C < 128 lanes (would force masked
            # partial stores) -> XLA's fused add is optimal there.  This is the
            # module's actual categorical use case (C ~ 4-20, small N).
            if total_bytes < (1 << 20) or C < 128:
                return x + b.reshape(1, C)
            return _add_bias_2d(x, b.reshape(1, C), target)

        # 4-D path: NCHW -> (N, C, H*W) is a free contiguous reshape that makes
        # the last (lane) dim dense.
        N, Cx, H, W = x.shape
        if total_bytes < (1 << 20) or H * W < 128:
            return x + b.reshape(1, C, 1, 1)
        x3 = x.reshape(N, Cx, H * W)
        out3 = _add_bias_3d(x3, b.reshape(1, C, 1), target)
        return out3.reshape(N, Cx, H, W)


if __name__ == "__main__":
    key = jax.random.PRNGKey(0)
    k_bias, k_x4, k_x2, k_b2, k_x2b, k_x4b, k_x4c = jax.random.split(key, 7)

    # --- small shapes matching the module's real (categorical) use ----------
    # These take the XLA fast path by design (C < 128, < 1 MiB).
    N, C, H, W = 2, 4, 16, 16
    bias = jax.random.normal(k_bias, (C,), dtype=jnp.float32)
    module = AddBias(bias)

    x4 = jax.random.normal(k_x4, (N, C, H, W), dtype=jnp.float32)
    out4 = jax.block_until_ready(module(x4))
    assert out4.shape == x4.shape and out4.dtype == x4.dtype
    assert jnp.allclose(out4, x4 + bias.reshape(1, C, 1, 1), atol=1e-6), "4D small mismatch"

    x2 = jax.random.normal(k_x2, (N, C), dtype=jnp.float32)
    out2 = jax.block_until_ready(module(x2))
    assert out2.shape == x2.shape and out2.dtype == x2.dtype
    assert jnp.allclose(out2, x2 + bias.reshape(1, C), atol=1e-6), "2D small mismatch"

    # --- larger shapes that exercise the Pallas kernels ---------------------
    C2 = 384
    bias2 = jax.random.normal(k_b2, (C2,), dtype=jnp.float32)
    module2 = AddBias(bias2)

    # 2-D Pallas path: ~6.3 MiB, full-C lanes, multi-step grid over rows
    # (non-aligned N to exercise a partial final row block).
    x2b = jax.random.normal(k_x2b, (4100, C2), dtype=jnp.float32)
    out2b = jax.block_until_ready(module2(x2b))
    assert jnp.allclose(out2b, x2b + bias2.reshape(1, C2), atol=1e-6), "2D tiled mismatch"

    # 4-D Pallas path: lane-dense (N, C, H*W), full-C/full-L blocks, grid over N.
    x4b = jax.random.normal(k_x4b, (4, C2, 32, 32), dtype=jnp.float32)
    out4b = jax.block_until_ready(module2(x4b))
    assert jnp.allclose(out4b, x4b + bias2.reshape(1, C2, 1, 1), atol=1e-6), "4D tiled mismatch"

    # 4-D Pallas path with C-tiling (C too large for one block) + partial C block.
    C3 = 1200
    bias3 = jax.random.normal(k_b2, (C3,), dtype=jnp.float32)
    module3 = AddBias(bias3)
    x4c = jax.random.normal(k_x4c, (2, C3, 32, 32), dtype=jnp.float32)
    out4c = jax.block_until_ready(module3(x4c))
    assert jnp.allclose(out4c, x4c + bias3.reshape(1, C3, 1, 1), atol=1e-6), "4D C-tiled mismatch"

    # bf16 2-D Pallas path (sublane alignment = 16; bias cast to bf16).
    x2c = x2b[:2048].astype(jnp.bfloat16)
    out2c = jax.block_until_ready(module2(x2c))
    ref2c = x2c + bias2.astype(jnp.bfloat16).reshape(1, C2)
    assert out2c.dtype == jnp.bfloat16
    assert jnp.allclose(out2c.astype(jnp.float32), ref2c.astype(jnp.float32),
                        atol=5e-2, rtol=1e-2), "2D bf16 mismatch"

    print("KERNEL_OK")
</pallas_src>

<mosaic_0001>
module attributes {stable_mosaic.version = 11 : i64} {
  func.func @_add_bias_kernel(%arg0: i32, %arg1: i32, %arg2: memref<1360x384xf32, #tpu.memory_space<vmem>>, %arg3: memref<1x384xf32, #tpu.memory_space<vmem>>, %arg4: memref<1360x384xf32, #tpu.memory_space<vmem>>) attributes {dimension_semantics = [#tpu.dimension_semantics<parallel>, #tpu.dimension_semantics<parallel>], iteration_bounds = array<i64: 4, 1>, scalar_prefetch = 0 : i64, scratch_operands = 0 : i64, tpu.core_type = #tpu.core_type<tc>, window_params = [{transform_indices = @transform_0, window_bounds = array<i64: 1360, 384>}, {transform_indices = @transform_1, window_bounds = array<i64: 1, 384>}, {transform_indices = @transform_2, window_bounds = array<i64: 1360, 384>}]} {
    %c0 = arith.constant 0 : index
    %c0_0 = arith.constant 0 : index
    %0 = vector.load %arg2[%c0, %c0_0] : memref<1360x384xf32, #tpu.memory_space<vmem>>, vector<1360x384xf32>
    %c0_1 = arith.constant 0 : index
    %c0_2 = arith.constant 0 : index
    %1 = vector.load %arg3[%c0_1, %c0_2] : memref<1x384xf32, #tpu.memory_space<vmem>>, vector<1x384xf32>
    %2 = vector.broadcast %1 : vector<1x384xf32> to vector<1360x384xf32>
    %3 = arith.addf %0, %2 : vector<1360x384xf32>
    %c0_3 = arith.constant 0 : index
    %c0_4 = arith.constant 0 : index
    %4 = vector.load %arg4[%c0_3, %c0_4] : memref<1360x384xf32, #tpu.memory_space<vmem>>, vector<1360x384xf32>
    tpu.vector_store %arg4[%c0_3, %c0_4], %3 {strides = array<i32>} : memref<1360x384xf32, #tpu.memory_space<vmem>>, vector<1360x384xf32>,
    return
  }
  func.func @transform_0(%arg0: i32, %arg1: i32) -> (i32, i32) {
    %c0_i32 = arith.constant 0 : i32
    return %arg0, %arg1 : i32, i32
  }
  func.func @transform_1(%arg0: i32, %arg1: i32) -> (i32, i32) {
    %c0_i32 = arith.constant 0 : i32
    %c0_i32_0 = arith.constant 0 : i32
    return %c0_i32, %arg1 : i32, i32
  }
  func.func @transform_2(%arg0: i32, %arg1: i32) -> (i32, i32) {
    %c0_i32 = arith.constant 0 : i32
    return %arg0, %arg1 : i32, i32
  }
}

</mosaic_0001>

<bundles_post_ra>
// kernel: tpu_custom_call.1
= control target key start
LH: loop header
LB: loop body
LE: loop exit
PB: predicated region body
PF: predicated region fallthrough
CT: control target
= control target key end

     0   :  { %7 = vsyncpa [#allocation3], 0  ;;  %s3924_s0 = inlined_call_operand.hbm [shape: f32[4100,384], index: 0, kind: input, shape index: {}]   ;;  %s3925_s1 = inlined_call_operand.hbm [shape: f32[1,384], index: 1, kind: input, shape index: {}]   ;;  %s3926_s2 = inlined_call_operand.hbm [shape: f32[4100,384], index: 2, kind: output, shape index: {}]  }
   0x1   :  { %9 = vsyncpa [#allocation3 + $0x1], 0 }
   0x2   :  { %10 = vsyncpa [#allocation6], 0 }
   0x3   :  { %11 = vsyncpa [#allocation4], 0 }
   0x4   :  { %13 = vsyncpa [#allocation4 + $0x1], 0  ;;  %s2155_s9 = smov 0   ;;  %s2157_s10 = smov 0  }
   0x5   :  { %s2159_s11 = smov 0   ;;  %s2161_s12 = smov 0  }
   0x6   :  { %s2163_s13 = smov 0   ;;  %s2165_s14 = smov 0  }
   0x7 LB: > { %s1894_s15 = sadd.s32 4294967295, %s2131_s14   ;;  %s1895_s16 = sadd.s32 4294967294, %s2131_s14   ;;  %s2131_s14 = sphi %s2165_s14, %s19_s14   ;;  %s2127_s13 = sphi %s2163_s13, %s3948_s13   ;;  %s2123_s12 = sphi %s2161_s12, %s3947_s12   ;;  %s2119_s11 = sphi %s2159_s11, %s3946_s11   ;;  %s2115_s10 = sphi %s2157_s10, %s3945_s10   ;;  %s2111_s9 = sphi %s2155_s9, %s3944_s9  }
   0x8   : > { %s31_s17 = sadd.s32 1, %s2127_s13  ;;  %s40_s18 = sadd.s32 1, %s2119_s11 }
   0x9   : > { %p33_p0 = scmp.ge.s32.totalorder %s31_s17, 4  ;;  %p47_p1 = scmp.ne.s32.totalorder %s2119_s11, %s2115_s10 }
   0xa   : > { %p48_p2 = scmp.eq.s32.totalorder %s2131_s14, 0  ;;  %p53_p3 = scmp.ne.s32.totalorder %s2115_s10, %s2111_s9 }
   0xb   : > { %s3950_s17 = smov (%p33_p0, %s31_s17), 0  ;;  %p2200_p5 = scmp.eq.s32.totalorder %s1894_s15, 0 }
   0xc   : > { %p2196_p4 = por %p48_p2, %p47_p1  ;;  %s35_s21 = ssub.s32 %s2127_s13, %s3950_s17 }
   0xd   : > { %s3932_s20 = scalar_select %p2200_p5, 1, 0 }
   0xe   : > { %s3931_s19 = scalar_select %p2196_p4, 1, 0 }
   0xf   : > { %p105_p6 = scmp.eq.s32.totalorder %s1894_s15, 3  ;;  %p38_p7 = scmp.eq.s32.totalorder %s35_s21, 0 }
  0x10   : > { %p2208_p8 = por %p2200_p5, %p53_p3  ;;  %p111_p10 = scmp.eq.s32.totalorder %s1895_s16, 3 }
  0x11   : > { %p2212_p9 = por %p105_p6, %p47_p1  ;;  %p1896_p12 = scmp.ge.s32.totalorder %s2131_s14, 1 }
  0x12   : > { %s3933_s22 = scalar_select %p2208_p8, 1, 0 }
  0x13   : > { %s3934_s23 = scalar_select %p2212_p9, 1, 0 }
  0x14   : > { %s2217_s24 = scalar_select %p38_p7, %s2119_s11, %s40_s18  }
  0x15   : > { %p2219_p11 = por %p111_p10, %p53_p3  ;;  %p118_p13 = scmp.lt.s32.totalorder %s2131_s14, 5 }
  0x16   : > { %s2133_s27 = smov [#allocation5]   ;;  %s1989_s4 = scalar_lea.hbm %s3925_s1, 48 }
  0x17   : > { %s3935_s25 = scalar_select %p2219_p11, 1, 0 }
  0x18   : > { %p2225_p0 = pnand %p1896_p12, %p118_p13  ;;  %s134_s28 = sshll.u32 %s2133_s27, 4  ;;  %s135_s28 = int_to_ptr.vmem [resolvable:$true] %s134_s28 }
  0x19   : > { %p1990_p3 = scmp.ne.s32.totalorder %s3925_s1, %s1989_s4  ;;  %p1996_p12 = scmp.lt.u32.totalorder %s1989_s4, %s3925_s1 }
  0x1a   : > { %s3936_s26 = scalar_select %p2225_p0, 1, 0 }
  0x1b   : > { %p1923_p1 = pneg %p2225_p0 }
  0x1d   : > { %p2233_p2 = pnand %p1923_p1, %p2200_p5 }
  0x1f   : > { %p1991_p6 = pneg %p2233_p2 }
  0x21   : > { %p1992_p7 = pnand %p1991_p6, %p1990_p3 }
  0x23   : > { %p1993_p10 = pneg %p1992_p7 }
  0x25   : > { %p1998_p13 = pnand %p1996_p12, %p1993_p10 }
  0x27   : > { %2001 = shalt.err (!%p1998_p13)
}
  0x28   : > { %s2002_s15 = scalar_lea.vmem %s135_s28, 48  ;;  %s2009_s16 = scalar_lea.vmem %s135_s28, 64 }
  0x29   : > { %p2003_p1 = scmp.ne.s32.totalorder %s135_s28, %s2002_s15  ;;  %p2010_p5 = scmp.lt.s32.totalorder %s135_s28, %s135_s28 }
  0x2a   : > { %p2011_p8 = scmp.lt.s32.totalorder %s2009_s16, %s2002_s15 }
  0x2b   : > { %p2005_p11 = pnand %p2003_p1, %p1991_p6 }
  0x2c   : > { %p2012_p0 = por %p2011_p8, %p2010_p5 }
  0x2d   : > { %p2006_p9 = pneg %p2005_p11 }
  0x2f   : > { %p2013_p4 = pnand %p2012_p0, %p2006_p9 }
  0x31   : > { %2016 = shalt.err (!%p2013_p4)
}
  0x32   : > { %1926 = dma.hbm_to_vmem [thread:$0]  (!%p2233_p2), %s3925_s1, 48, %s135_s28, [#allocation6]  }
  0x33   : > { %p1898_p3 = scmp.ge.s32.totalorder %s2131_s14, 4 }
  0x34   : > { %p3938_p7 = scmp.ne.s32.totalorder (!%p1898_p3), %s3931_s19, 0 }
  0x35   : > { %141 = sbr.rel (%p1898_p3) target bundleno = 96 (0x60), region = 20 }
  0x3c   : > { %144 = sbr.rel (!%p3938_p7) target bundleno = 96 (0x60), region = 24  ;;  %s145_s27 = sand.u32 (%p3938_p7), 1, %s2119_s11  }
  0x3d   : > { %s150_s30 = smul.u32 (%p3938_p7), 170, %s2127_s13  ;;  %s2261_s6 = scalar_lea.sflag (%p3938_p7), [#allocation3], %s145_s27 }
  0x3e   : > { %s1913_s3 = smul.u32 (%p3938_p7), 4080, %s145_s27 }
  0x3f   : > { %s152_s4 = ssub.s32 (%p3938_p7), 513, %s150_s30 }
  0x40   : > { %p153_p5 = scmp.lt.s32.totalorder (%p3938_p7), %s152_s4, 170  ;;  %s149_s28 = scalar_lea.vmem (%p3938_p7), [#allocation2], %s1913_s3 }
  0x43   : > { %s3952_s4 = smov (!%p153_p5, %s152_s4), 170 }
  0x44   : > { %s2258_s5 = smul.u32 384, %s3952_s4 }
  0x46   : > { %s158_s29 = ssub.s32 65280, %s2258_s5 }
  0x47   : > { %159 = vsyncadd %s2261_s6, %s158_s29  ;;  %p1901_p4 = scmp.ne.s32.totalorder %s2258_s5, 0  ;;  %s1932_s19 = smul.u32 65280, %s2127_s13 }
  0x48   : > { %s166_s7 = sshll.u32 %s149_s28, 4  ;;  %s2021_s30 = scalar_lea.hbm %s3924_s0, 196992  ;;  %s2271_s7 = int_to_ptr.vmem [resolvable:$true] %s166_s7 }
  0x49   : > { %s2269_s16 = scalar_lea.hbm %s3924_s0, %s1932_s19 }
  0x4a   : > { %s2017_s18 = scalar_lea.hbm %s2269_s16, %s2258_s5  ;;  %p2022_p0 = scmp.lt.u32.totalorder %s2269_s16, %s3924_s0 }
  0x4b   : > { %p2018_p8 = scmp.ne.s32.totalorder %s2269_s16, %s2017_s18  ;;  %p2023_p2 = scmp.lt.u32.totalorder %s2021_s30, %s2017_s18 }
  0x4c   : > { %p2025_p10 = scmp.lt.u32.totalorder %s2017_s18, %s2269_s16 }
  0x4d   : > { %p2019_p9 = pnand %p2018_p8, %p1901_p4  ;;  %p2024_p6 = por %p2023_p2, %p2022_p0 }
  0x4f   : > { %p2020_p11 = pneg %p2019_p9  ;;  %p2026_p12 = por %p2025_p10, %p2024_p6 }
  0x51   : > { %p2027_p13 = pnand %p2026_p12, %p2020_p11 }
  0x53   : > { %2030 = shalt.err (!%p2027_p13)
}
  0x54   : > { %s2031_s29 = scalar_lea.vmem %s2271_s7, %s2258_s5  ;;  %s2134_s28 = smov [#allocation2]  }
  0x55   : > { %p2032_p1 = scmp.ne.s32.totalorder %s2271_s7, %s2031_s29  ;;  %s2035_s19 = sshll.u32 %s2134_s28, 4  ;;  %s2036_s19 = int_to_ptr.vmem [resolvable:$false] %s2035_s19 }
  0x56   : > { %s2037_s8 = scalar_lea.vmem %s2036_s19, 130560  ;;  %p2038_p5 = scmp.lt.s32.totalorder %s2271_s7, %s2036_s19 }
  0x57   : > { %p2033_p3 = pnand %p2032_p1, %p1901_p4  ;;  %p2039_p8 = scmp.lt.s32.totalorder %s2037_s8, %s2031_s29 }
  0x59   : > { %p2034_p7 = pneg %p2033_p3  ;;  %p2040_p9 = por %p2039_p8, %p2038_p5 }
  0x5b   : > { %p2041_p0 = pnand %p2040_p9, %p2034_p7 }
  0x5d   : > { %2044 = shalt.err (!%p2041_p0)
}
  0x5e   : > { %s2135_s15 = smov 384   ;;  %s2136_s18 = smov 24  }
  0x5f   : > { %172 = dma.hbm_to_vmem [thread:$0]  (%p1901_p4), %s2269_s16, %s2258_s5, %s2271_s7, %s2261_s6, %s2135_s15, %s2135_s15, %s2136_s18  }
  0x60 PF: > { %p3939_p11 = scmp.ne.s32.totalorder %s3936_s26, 0 }
  0x61   : > { %s2301_s21 = sand.u32 (!%p3939_p11), 1, %s2115_s10   ;;  %p3940_p2 = scmp.ne.s32.totalorder (!%p3939_p11), %s3933_s22, 0 }
  0x62   : > { %178 = sbr.rel (%p3939_p11) target bundleno = 403 (0x193), region = 28  ;;  %s181_s30 = scalar_lea.sflag (!%p3939_p11), [#allocation3], %s2301_s21 }
  0x63   : > { %s1915_s27 = smul.u32 (!%p3939_p11), 4080, %s2301_s21 }
  0x65   : > { %s2307_s3 = scalar_lea.vmem (!%p3939_p11), [#allocation2], %s1915_s27 }
  0x69   : > { %2098 = dma.done.wait (%p3940_p2), %s181_s30, 65280  }
  0x6a   : > { %2100 = vsyncadd (%p3940_p2), %s181_s30, 4294902016  ;;  %p3941_p4 = scmp.ne.s32.totalorder %s3932_s20, 0 }
  0x6c   : > { %2102 = dma.done.wait (%p3941_p4), [#allocation6], 48  }
  0x6d   : > { %2104 = vsyncadd (%p3941_p4), [#allocation6], 4294967248  ;;  %v736_v0 = vlaneseq  ;;  %v224_v5 = vld [vmem:[%s2307_s3] sm:$0xff]  ;;  %v225_v7 = vld [vmem:[%s2307_s3 + $0x8] sm:$0xff]  ;;  %s2347_s20 = scalar_lea.vmem [#allocation7], %s1915_s27  ;;  %s1772_s22 = scalar_lea.sflag [#allocation4], %s2301_s21 }
  0x6e   : > { %v734_v6 = vld [vmem:[#allocation5] sm:$0x7]  ;;  %v227_v12 = vld [vmem:[%s2307_s3 + $0x18] sm:$0xff]  ;;  %v229_v14 = vld [vmem:[%s2307_s3 + $0x28] sm:$0xff]  ;;  %p3942_p6 = scmp.ne.s32.totalorder %s3934_s23, 0 }
  0x6f   : > { %v737_v1 = vshrl.u32 %v736_v0, 7  ;;  %v226_v10 = vld [vmem:[%s2307_s3 + $0x10] sm:$0xff]  ;;  %v228_v13 = vld [vmem:[%s2307_s3 + $0x20] sm:$0xff]  ;;  %v231_v16 = vld [vmem:[%s2307_s3 + $0x38] sm:$0xff]  ;;  %s1779_s26 = smul.u32 (%p3942_p6), 170, %s2123_s12 }
  0x70   : > { %v230_v15 = vld [vmem:[%s2307_s3 + $0x30] sm:$0xff]  ;;  %v232_v21 = vld [vmem:[%s2307_s3 + $0x40] sm:$0xff]  ;;  %v233_v22 = vld [vmem:[%s2307_s3 + $0x48] sm:$0xff] }
  0x71   : > { %v738_v2 = vsub.s32 0, %v737_v1  ;;  %v742_v3 = vsub.s32 1, %v737_v1  ;;  %v746_v4 = vsub.s32 2, %v737_v1  ;;  %v234_v23 = vld [vmem:[%s2307_s3 + $0x50] sm:$0xff]  ;;  %v235_v28 = vld [vmem:[%s2307_s3 + $0x58] sm:$0xff]  ;;  %v236_v29 = vld [vmem:[%s2307_s3 + $0x60] sm:$0xff] }
  0x72   : > { %v237_v30 = vld [vmem:[%s2307_s3 + $0x68] sm:$0xff]  ;;  %v238_v35 = vld [vmem:[%s2307_s3 + $0x70] sm:$0xff]  ;;  %v239_v36 = vld [vmem:[%s2307_s3 + $0x78] sm:$0xff]  ;;  %s1781_s5 = ssub.s32 (%p3942_p6), 513, %s1779_s26 }
  0x73   : > { %v2319_v8 = vrot.slane %v734_v6, %v738_v2  ;;  %v2321_v9 = vrot.slane %v734_v6, %v742_v3  ;;  %v2324_v11 = vrot.slane %v734_v6, %v746_v4  ;;  %v240_v37 = vld [vmem:[%s2307_s3 + $0x80] sm:$0xff]  ;;  %v241_v42 = vld [vmem:[%s2307_s3 + $0x88] sm:$0xff]  ;;  %v242_v43 = vld [vmem:[%s2307_s3 + $0x90] sm:$0xff]  ;;  %p1782_p10 = scmp.lt.s32.totalorder (%p3942_p6), %s1781_s5, 170 }
  0x74   : > { %v243_v44 = vld [vmem:[%s2307_s3 + $0x98] sm:$0xff]  ;;  %v244_v49 = vld [vmem:[%s2307_s3 + $0xa0] sm:$0xff]  ;;  %v245_v50 = vld [vmem:[%s2307_s3 + $0xa8] sm:$0xff] }
  0x75   : > { %v751_v17 = vadd.f32 %v2319_v8, %v224_v5  ;;  %v752_v18 = vadd.f32 %v2321_v9, %v225_v7  ;;  %v753_v19 = vadd.f32 %v2324_v11, %v226_v10  ;;  %v754_v20 = vadd.f32 %v2319_v8, %v227_v12  ;;  %v246_v51 = vld [vmem:[%s2307_s3 + $0xb0] sm:$0xff]  ;;  %v247_v55 = vld [vmem:[%s2307_s3 + $0xb8] sm:$0xff]  ;;  %v248_v56 = vld [vmem:[%s2307_s3 + $0xc0] sm:$0xff] }
  0x76   : > { %v755_v24 = vadd.f32 %v2321_v9, %v228_v13  ;;  %v756_v25 = vadd.f32 %v2324_v11, %v229_v14  ;;  %v757_v26 = vadd.f32 %v2319_v8, %v230_v15  ;;  %v758_v27 = vadd.f32 %v2321_v9, %v231_v16  ;;  %v249_v57 = vld [vmem:[%s2307_s3 + $0xc8] sm:$0xff]  ;;  %v250_v61 = vld [vmem:[%s2307_s3 + $0xd0] sm:$0xff]  ;;  %v251_v62 = vld [vmem:[%s2307_s3 + $0xd8] sm:$0xff] }
  0x77   : > { %1261 = vst [vmem:[%s2347_s20] sm:$0xff] %v751_v17  ;;  %1262 = vst [vmem:[%s2347_s20 + $0x8] sm:$0xff] %v752_v18  ;;  %v759_v31 = vadd.f32 %v2324_v11, %v232_v21  ;;  %v760_v32 = vadd.f32 %v2319_v8, %v233_v22  ;;  %v761_v33 = vadd.f32 %v2321_v9, %v234_v23  ;;  %v252_v63 = vld [vmem:[%s2307_s3 + $0xe0] sm:$0xff]  ;;  %v253_v3 = vld [vmem:[%s2307_s3 + $0xe8] sm:$0xff] }
  0x78   : > { %1263 = vst [vmem:[%s2347_s20 + $0x10] sm:$0xff] %v753_v19  ;;  %1264 = vst [vmem:[%s2347_s20 + $0x18] sm:$0xff] %v754_v20  ;;  %v762_v34 = vadd.f32 %v2324_v11, %v235_v28  ;;  %v763_v38 = vadd.f32 %v2319_v8, %v236_v29  ;;  %v764_v39 = vadd.f32 %v2321_v9, %v237_v30  ;;  %v254_v4 = vld [vmem:[%s2307_s3 + $0xf0] sm:$0xff]  ;;  %v255_v5 = vld [vmem:[%s2307_s3 + $0xf8] sm:$0xff] }
  0x79   : > { %1265 = vst [vmem:[%s2347_s20 + $0x20] sm:$0xff] %v755_v24  ;;  %1266 = vst [vmem:[%s2347_s20 + $0x28] sm:$0xff] %v756_v25  ;;  %v765_v40 = vadd.f32 %v2324_v11, %v238_v35  ;;  %v766_v41 = vadd.f32 %v2319_v8, %v239_v36  ;;  %v767_v45 = vadd.f32 %v2321_v9, %v240_v37  ;;  %v256_v12 = vld [vmem:[%s2307_s3 + $0x100] sm:$0xff]  ;;  %v257_v13 = vld [vmem:[%s2307_s3 + $0x108] sm:$0xff] }
  0x7a   : > { %1267 = vst [vmem:[%s2347_s20 + $0x30] sm:$0xff] %v757_v26  ;;  %1268 = vst [vmem:[%s2347_s20 + $0x38] sm:$0xff] %v758_v27  ;;  %v768_v46 = vadd.f32 %v2324_v11, %v241_v42  ;;  %v769_v47 = vadd.f32 %v2319_v8, %v242_v43  ;;  %v770_v48 = vadd.f32 %v2321_v9, %v243_v44  ;;  %v258_v14 = vld [vmem:[%s2307_s3 + $0x110] sm:$0xff]  ;;  %v259_v18 = vld [vmem:[%s2307_s3 + $0x118] sm:$0xff] }
  0x7b   : > { %1269 = vst [vmem:[%s2347_s20 + $0x40] sm:$0xff] %v759_v31  ;;  %1270 = vst [vmem:[%s2347_s20 + $0x48] sm:$0xff] %v760_v32  ;;  %v771_v52 = vadd.f32 %v2324_v11, %v244_v49  ;;  %v772_v53 = vadd.f32 %v2319_v8, %v245_v50  ;;  %v773_v54 = vadd.f32 %v2321_v9, %v246_v51  ;;  %v260_v19 = vld [vmem:[%s2307_s3 + $0x120] sm:$0xff]  ;;  %v261_v20 = vld [vmem:[%s2307_s3 + $0x128] sm:$0xff] }
  0x7c   : > { %1271 = vst [vmem:[%s2347_s20 + $0x50] sm:$0xff] %v761_v33  ;;  %1272 = vst [vmem:[%s2347_s20 + $0x58] sm:$0xff] %v762_v34  ;;  %v774_v58 = vadd.f32 %v2324_v11, %v247_v55  ;;  %v775_v59 = vadd.f32 %v2319_v8, %v248_v56  ;;  %v776_v60 = vadd.f32 %v2321_v9, %v249_v57  ;;  %v262_v24 = vld [vmem:[%s2307_s3 + $0x130] sm:$0xff]  ;;  %v263_v25 = vld [vmem:[%s2307_s3 + $0x138] sm:$0xff] }
  0x7d   : > { %1273 = vst [vmem:[%s2347_s20 + $0x60] sm:$0xff] %v763_v38  ;;  %1274 = vst [vmem:[%s2347_s20 + $0x68] sm:$0xff] %v764_v39  ;;  %v777_v0 = vadd.f32 %v2324_v11, %v250_v61  ;;  %v778_v1 = vadd.f32 %v2319_v8, %v251_v62  ;;  %v779_v2 = vadd.f32 %v2321_v9, %v252_v63  ;;  %v264_v26 = vld [vmem:[%s2307_s3 + $0x140] sm:$0xff]  ;;  %v265_v30 = vld [vmem:[%s2307_s3 + $0x148] sm:$0xff] }
  0x7e   : > { %1275 = vst [vmem:[%s2347_s20 + $0x70] sm:$0xff] %v765_v40  ;;  %1276 = vst [vmem:[%s2347_s20 + $0x78] sm:$0xff] %v766_v41  ;;  %v780_v6 = vadd.f32 %v2324_v11, %v253_v3  ;;  %v781_v7 = vadd.f32 %v2319_v8, %v254_v4  ;;  %v782_v10 = vadd.f32 %v2321_v9, %v255_v5  ;;  %v266_v31 = vld [vmem:[%s2307_s3 + $0x150] sm:$0xff]  ;;  %v267_v32 = vld [vmem:[%s2307_s3 + $0x158] sm:$0xff] }
  0x7f   : > { %1277 = vst [vmem:[%s2347_s20 + $0x80] sm:$0xff] %v767_v45  ;;  %1278 = vst [vmem:[%s2347_s20 + $0x88] sm:$0xff] %v768_v46  ;;  %v783_v15 = vadd.f32 %v2324_v11, %v256_v12  ;;  %v784_v16 = vadd.f32 %v2319_v8, %v257_v13  ;;  %v785_v17 = vadd.f32 %v2321_v9, %v258_v14  ;;  %v268_v36 = vld [vmem:[%s2307_s3 + $0x160] sm:$0xff]  ;;  %v269_v37 = vld [vmem:[%s2307_s3 + $0x168] sm:$0xff] }
  0x80   : > { %1279 = vst [vmem:[%s2347_s20 + $0x90] sm:$0xff] %v769_v47  ;;  %1280 = vst [vmem:[%s2347_s20 + $0x98] sm:$0xff] %v770_v48  ;;  %v786_v21 = vadd.f32 %v2324_v11, %v259_v18  ;;  %v787_v22 = vadd.f32 %v2319_v8, %v260_v19  ;;  %v788_v23 = vadd.f32 %v2321_v9, %v261_v20  ;;  %v270_v38 = vld [vmem:[%s2307_s3 + $0x170] sm:$0xff]  ;;  %v271_v42 = vld [vmem:[%s2307_s3 + $0x178] sm:$0xff] }
  0x81   : > { %1281 = vst [vmem:[%s2347_s20 + $0xa0] sm:$0xff] %v771_v52  ;;  %1282 = vst [vmem:[%s2347_s20 + $0xa8] sm:$0xff] %v772_v53  ;;  %v789_v27 = vadd.f32 %v2324_v11, %v262_v24  ;;  %v790_v28 = vadd.f32 %v2319_v8, %v263_v25  ;;  %v791_v29 = vadd.f32 %v2321_v9, %v264_v26  ;;  %v272_v43 = vld [vmem:[%s2307_s3 + $0x180] sm:$0xff]  ;;  %v273_v44 = vld [vmem:[%s2307_s3 + $0x188] sm:$0xff] }
  0x82   : > { %1283 = vst [vmem:[%s2347_s20 + $0xb0] sm:$0xff] %v773_v54  ;;  %1284 = vst [vmem:[%s2347_s20 + $0xb8] sm:$0xff] %v774_v58  ;;  %v792_v33 = vadd.f32 %v2324_v11, %v265_v30  ;;  %v793_v34 = vadd.f32 %v2319_v8, %v266_v31  ;;  %v794_v35 = vadd.f32 %v2321_v9, %v267_v32  ;;  %v274_v48 = vld [vmem:[%s2307_s3 + $0x190] sm:$0xff]  ;;  %v275_v49 = vld [vmem:[%s2307_s3 + $0x198] sm:$0xff] }
  0x83   : > { %1285 = vst [vmem:[%s2347_s20 + $0xc0] sm:$0xff] %v775_v59  ;;  %1286 = vst [vmem:[%s2347_s20 + $0xc8] sm:$0xff] %v776_v60  ;;  %v795_v39 = vadd.f32 %v2324_v11, %v268_v36  ;;  %v796_v40 = vadd.f32 %v2319_v8, %v269_v37  ;;  %v797_v41 = vadd.f32 %v2321_v9, %v270_v38  ;;  %v276_v50 = vld [vmem:[%s2307_s3 + $0x1a0] sm:$0xff]  ;;  %v277_v54 = vld [vmem:[%s2307_s3 + $0x1a8] sm:$0xff] }
  0x84   : > { %1287 = vst [vmem:[%s2347_s20 + $0xd0] sm:$0xff] %v777_v0  ;;  %1288 = vst [vmem:[%s2347_s20 + $0xd8] sm:$0xff] %v778_v1  ;;  %v798_v45 = vadd.f32 %v2324_v11, %v271_v42  ;;  %v799_v46 = vadd.f32 %v2319_v8, %v272_v43  ;;  %v800_v47 = vadd.f32 %v2321_v9, %v273_v44  ;;  %v278_v55 = vld [vmem:[%s2307_s3 + $0x1b0] sm:$0xff]  ;;  %v279_v56 = vld [vmem:[%s2307_s3 + $0x1b8] sm:$0xff] }
  0x85   : > { %1289 = vst [vmem:[%s2347_s20 + $0xe0] sm:$0xff] %v779_v2  ;;  %1290 = vst [vmem:[%s2347_s20 + $0xe8] sm:$0xff] %v780_v6  ;;  %v801_v51 = vadd.f32 %v2324_v11, %v274_v48  ;;  %v802_v52 = vadd.f32 %v2319_v8, %v275_v49  ;;  %v803_v53 = vadd.f32 %v2321_v9, %v276_v50  ;;  %v280_v60 = vld [vmem:[%s2307_s3 + $0x1c0] sm:$0xff]  ;;  %v281_v61 = vld [vmem:[%s2307_s3 + $0x1c8] sm:$0xff] }
  0x86   : > { %1291 = vst [vmem:[%s2347_s20 + $0xf0] sm:$0xff] %v781_v7  ;;  %1292 = vst [vmem:[%s2347_s20 + $0xf8] sm:$0xff] %v782_v10  ;;  %v804_v57 = vadd.f32 %v2324_v11, %v277_v54  ;;  %v805_v58 = vadd.f32 %v2319_v8, %v278_v55  ;;  %v806_v59 = vadd.f32 %v2321_v9, %v279_v56  ;;  %v282_v62 = vld [vmem:[%s2307_s3 + $0x1d0] sm:$0xff]  ;;  %v283_v2 = vld [vmem:[%s2307_s3 + $0x1d8] sm:$0xff] }
  0x87   : > { %1293 = vst [vmem:[%s2347_s20 + $0x100] sm:$0xff] %v783_v15  ;;  %1294 = vst [vmem:[%s2347_s20 + $0x108] sm:$0xff] %v784_v16  ;;  %v807_v63 = vadd.f32 %v2324_v11, %v280_v60  ;;  %v808_v0 = vadd.f32 %v2319_v8, %v281_v61  ;;  %v809_v1 = vadd.f32 %v2321_v9, %v282_v62  ;;  %v284_v3 = vld [vmem:[%s2307_s3 + $0x1e0] sm:$0xff]  ;;  %v285_v4 = vld [vmem:[%s2307_s3 + $0x1e8] sm:$0xff] }
  0x88   : > { %1295 = vst [vmem:[%s2347_s20 + $0x110] sm:$0xff] %v785_v17  ;;  %1296 = vst [vmem:[%s2347_s20 + $0x118] sm:$0xff] %v786_v21  ;;  %v810_v5 = vadd.f32 %v2324_v11, %v283_v2  ;;  %v811_v6 = vadd.f32 %v2319_v8, %v284_v3  ;;  %v812_v7 = vadd.f32 %v2321_v9, %v285_v4  ;;  %v286_v10 = vld [vmem:[%s2307_s3 + $0x1f0] sm:$0xff]  ;;  %v287_v12 = vld [vmem:[%s2307_s3 + $0x1f8] sm:$0xff] }
  0x89   : > { %1297 = vst [vmem:[%s2347_s20 + $0x120] sm:$0xff] %v787_v22  ;;  %1298 = vst [vmem:[%s2347_s20 + $0x128] sm:$0xff] %v788_v23  ;;  %v288_v13 = vld [vmem:[%s2307_s3 + $0x200] sm:$0xff]  ;;  %v813_v14 = vadd.f32 %v2324_v11, %v286_v10  ;;  %v814_v15 = vadd.f32 %v2319_v8, %v287_v12  ;;  %v289_v17 = vld [vmem:[%s2307_s3 + $0x208] sm:$0xff] }
  0x8a   : > { %1299 = vst [vmem:[%s2347_s20 + $0x130] sm:$0xff] %v789_v27  ;;  %1300 = vst [vmem:[%s2347_s20 + $0x138] sm:$0xff] %v790_v28  ;;  %v815_v16 = vadd.f32 %v2321_v9, %v288_v13  ;;  %v290_v18 = vld [vmem:[%s2307_s3 + $0x210] sm:$0xff]  ;;  %v291_v19 = vld [vmem:[%s2307_s3 + $0x218] sm:$0xff]  ;;  %v816_v20 = vadd.f32 %v2324_v11, %v289_v17 }
  0x8b   : > { %1301 = vst [vmem:[%s2347_s20 + $0x140] sm:$0xff] %v791_v29  ;;  %1302 = vst [vmem:[%s2347_s20 + $0x148] sm:$0xff] %v792_v33  ;;  %v817_v21 = vadd.f32 %v2319_v8, %v290_v18  ;;  %v818_v22 = vadd.f32 %v2321_v9, %v291_v19  ;;  %v292_v23 = vld [vmem:[%s2307_s3 + $0x220] sm:$0xff]  ;;  %v293_v24 = vld [vmem:[%s2307_s3 + $0x228] sm:$0xff] }
  0x8c   : > { %1303 = vst [vmem:[%s2347_s20 + $0x150] sm:$0xff] %v793_v34  ;;  %1304 = vst [vmem:[%s2347_s20 + $0x158] sm:$0xff] %v794_v35  ;;  %v294_v25 = vld [vmem:[%s2307_s3 + $0x230] sm:$0xff]  ;;  %v819_v26 = vadd.f32 %v2324_v11, %v292_v23  ;;  %v820_v27 = vadd.f32 %v2319_v8, %v293_v24  ;;  %v295_v29 = vld [vmem:[%s2307_s3 + $0x238] sm:$0xff] }
  0x8d   : > { %1305 = vst [vmem:[%s2347_s20 + $0x160] sm:$0xff] %v795_v39  ;;  %1306 = vst [vmem:[%s2347_s20 + $0x168] sm:$0xff] %v796_v40  ;;  %v821_v28 = vadd.f32 %v2321_v9, %v294_v25  ;;  %v296_v30 = vld [vmem:[%s2307_s3 + $0x240] sm:$0xff]  ;;  %v297_v31 = vld [vmem:[%s2307_s3 + $0x248] sm:$0xff]  ;;  %v822_v32 = vadd.f32 %v2324_v11, %v295_v29 }
  0x8e   : > { %1307 = vst [vmem:[%s2347_s20 + $0x170] sm:$0xff] %v797_v41  ;;  %1308 = vst [vmem:[%s2347_s20 + $0x178] sm:$0xff] %v798_v45  ;;  %v823_v33 = vadd.f32 %v2319_v8, %v296_v30  ;;  %v824_v34 = vadd.f32 %v2321_v9, %v297_v31  ;;  %v298_v35 = vld [vmem:[%s2307_s3 + $0x250] sm:$0xff]  ;;  %v299_v36 = vld [vmem:[%s2307_s3 + $0x258] sm:$0xff] }
  0x8f   : > { %1309 = vst [vmem:[%s2347_s20 + $0x180] sm:$0xff] %v799_v46  ;;  %1310 = vst [vmem:[%s2347_s20 + $0x188] sm:$0xff] %v800_v47  ;;  %v300_v37 = vld [vmem:[%s2307_s3 + $0x260] sm:$0xff]  ;;  %v825_v38 = vadd.f32 %v2324_v11, %v298_v35  ;;  %v826_v39 = vadd.f32 %v2319_v8, %v299_v36  ;;  %v301_v41 = vld [vmem:[%s2307_s3 + $0x268] sm:$0xff] }
  0x90   : > { %1311 = vst [vmem:[%s2347_s20 + $0x190] sm:$0xff] %v801_v51  ;;  %1312 = vst [vmem:[%s2347_s20 + $0x198] sm:$0xff] %v802_v52  ;;  %v827_v40 = vadd.f32 %v2321_v9, %v300_v37  ;;  %v302_v42 = vld [vmem:[%s2307_s3 + $0x270] sm:$0xff]  ;;  %v303_v43 = vld [vmem:[%s2307_s3 + $0x278] sm:$0xff]  ;;  %v828_v44 = vadd.f32 %v2324_v11, %v301_v41 }
  0x91   : > { %1313 = vst [vmem:[%s2347_s20 + $0x1a0] sm:$0xff] %v803_v53  ;;  %1314 = vst [vmem:[%s2347_s20 + $0x1a8] sm:$0xff] %v804_v57  ;;  %v829_v45 = vadd.f32 %v2319_v8, %v302_v42  ;;  %v830_v46 = vadd.f32 %v2321_v9, %v303_v43  ;;  %v304_v47 = vld [vmem:[%s2307_s3 + $0x280] sm:$0xff]  ;;  %v305_v48 = vld [vmem:[%s2307_s3 + $0x288] sm:$0xff] }
  0x92   : > { %1315 = vst [vmem:[%s2347_s20 + $0x1b0] sm:$0xff] %v805_v58  ;;  %1316 = vst [vmem:[%s2347_s20 + $0x1b8] sm:$0xff] %v806_v59  ;;  %v306_v49 = vld [vmem:[%s2307_s3 + $0x290] sm:$0xff]  ;;  %v831_v50 = vadd.f32 %v2324_v11, %v304_v47  ;;  %v832_v51 = vadd.f32 %v2319_v8, %v305_v48  ;;  %v307_v53 = vld [vmem:[%s2307_s3 + $0x298] sm:$0xff] }
  0x93   : > { %1317 = vst [vmem:[%s2347_s20 + $0x1c0] sm:$0xff] %v807_v63  ;;  %1318 = vst [vmem:[%s2347_s20 + $0x1c8] sm:$0xff] %v808_v0  ;;  %v833_v52 = vadd.f32 %v2321_v9, %v306_v49  ;;  %v308_v54 = vld [vmem:[%s2307_s3 + $0x2a0] sm:$0xff]  ;;  %v309_v55 = vld [vmem:[%s2307_s3 + $0x2a8] sm:$0xff]  ;;  %v834_v56 = vadd.f32 %v2324_v11, %v307_v53 }
  0x94   : > { %1319 = vst [vmem:[%s2347_s20 + $0x1d0] sm:$0xff] %v809_v1  ;;  %1320 = vst [vmem:[%s2347_s20 + $0x1d8] sm:$0xff] %v810_v5  ;;  %v835_v57 = vadd.f32 %v2319_v8, %v308_v54  ;;  %v836_v58 = vadd.f32 %v2321_v9, %v309_v55  ;;  %v310_v59 = vld [vmem:[%s2307_s3 + $0x2b0] sm:$0xff]  ;;  %v311_v60 = vld [vmem:[%s2307_s3 + $0x2b8] sm:$0xff] }
  0x95   : > { %1321 = vst [vmem:[%s2347_s20 + $0x1e0] sm:$0xff] %v811_v6  ;;  %1322 = vst [vmem:[%s2347_s20 + $0x1e8] sm:$0xff] %v812_v7  ;;  %v312_v61 = vld [vmem:[%s2307_s3 + $0x2c0] sm:$0xff]  ;;  %v837_v62 = vadd.f32 %v2324_v11, %v310_v59  ;;  %v838_v63 = vadd.f32 %v2319_v8, %v311_v60  ;;  %v313_v1 = vld [vmem:[%s2307_s3 + $0x2c8] sm:$0xff] }
  0x96   : > { %1323 = vst [vmem:[%s2347_s20 + $0x1f0] sm:$0xff] %v813_v14  ;;  %1324 = vst [vmem:[%s2347_s20 + $0x1f8] sm:$0xff] %v814_v15  ;;  %v839_v0 = vadd.f32 %v2321_v9, %v312_v61  ;;  %v314_v2 = vld [vmem:[%s2307_s3 + $0x2d0] sm:$0xff]  ;;  %v315_v3 = vld [vmem:[%s2307_s3 + $0x2d8] sm:$0xff]  ;;  %v840_v4 = vadd.f32 %v2324_v11, %v313_v1 }
  0x97   : > { %1325 = vst [vmem:[%s2347_s20 + $0x200] sm:$0xff] %v815_v16  ;;  %1326 = vst [vmem:[%s2347_s20 + $0x208] sm:$0xff] %v816_v20  ;;  %v841_v5 = vadd.f32 %v2319_v8, %v314_v2  ;;  %v842_v6 = vadd.f32 %v2321_v9, %v315_v3  ;;  %v316_v7 = vld [vmem:[%s2307_s3 + $0x2e0] sm:$0xff]  ;;  %v317_v10 = vld [vmem:[%s2307_s3 + $0x2e8] sm:$0xff] }
  0x98   : > { %1327 = vst [vmem:[%s2347_s20 + $0x210] sm:$0xff] %v817_v21  ;;  %1328 = vst [vmem:[%s2347_s20 + $0x218] sm:$0xff] %v818_v22  ;;  %v318_v12 = vld [vmem:[%s2307_s3 + $0x2f0] sm:$0xff]  ;;  %v843_v13 = vadd.f32 %v2324_v11, %v316_v7  ;;  %v844_v14 = vadd.f32 %v2319_v8, %v317_v10  ;;  %v319_v16 = vld [vmem:[%s2307_s3 + $0x2f8] sm:$0xff] }
  0x99   : > { %1329 = vst [vmem:[%s2347_s20 + $0x220] sm:$0xff] %v819_v26  ;;  %1330 = vst [vmem:[%s2347_s20 + $0x228] sm:$0xff] %v820_v27  ;;  %v845_v15 = vadd.f32 %v2321_v9, %v318_v12  ;;  %v320_v17 = vld [vmem:[%s2307_s3 + $0x300] sm:$0xff]  ;;  %v321_v18 = vld [vmem:[%s2307_s3 + $0x308] sm:$0xff]  ;;  %v846_v19 = vadd.f32 %v2324_v11, %v319_v16 }
  0x9a   : > { %1331 = vst [vmem:[%s2347_s20 + $0x230] sm:$0xff] %v821_v28  ;;  %1332 = vst [vmem:[%s2347_s20 + $0x238] sm:$0xff] %v822_v32  ;;  %v847_v20 = vadd.f32 %v2319_v8, %v320_v17  ;;  %v848_v21 = vadd.f32 %v2321_v9, %v321_v18  ;;  %v322_v22 = vld [vmem:[%s2307_s3 + $0x310] sm:$0xff]  ;;  %v323_v23 = vld [vmem:[%s2307_s3 + $0x318] sm:$0xff] }
  0x9b   : > { %1333 = vst [vmem:[%s2347_s20 + $0x240] sm:$0xff] %v823_v33  ;;  %1334 = vst [vmem:[%s2347_s20 + $0x248] sm:$0xff] %v824_v34  ;;  %v324_v24 = vld [vmem:[%s2307_s3 + $0x320] sm:$0xff]  ;;  %v849_v25 = vadd.f32 %v2324_v11, %v322_v22  ;;  %v850_v26 = vadd.f32 %v2319_v8, %v323_v23  ;;  %v325_v28 = vld [vmem:[%s2307_s3 + $0x328] sm:$0xff] }
  0x9c   : > { %1335 = vst [vmem:[%s2347_s20 + $0x250] sm:$0xff] %v825_v38  ;;  %1336 = vst [vmem:[%s2347_s20 + $0x258] sm:$0xff] %v826_v39  ;;  %v851_v27 = vadd.f32 %v2321_v9, %v324_v24  ;;  %v326_v29 = vld [vmem:[%s2307_s3 + $0x330] sm:$0xff]  ;;  %v327_v30 = vld [vmem:[%s2307_s3 + $0x338] sm:$0xff]  ;;  %v852_v31 = vadd.f32 %v2324_v11, %v325_v28 }
  0x9d   : > { %1337 = vst [vmem:[%s2347_s20 + $0x260] sm:$0xff] %v827_v40  ;;  %1338 = vst [vmem:[%s2347_s20 + $0x268] sm:$0xff] %v828_v44  ;;  %v853_v32 = vadd.f32 %v2319_v8, %v326_v29  ;;  %v854_v33 = vadd.f32 %v2321_v9, %v327_v30  ;;  %v328_v34 = vld [vmem:[%s2307_s3 + $0x340] sm:$0xff]  ;;  %v329_v35 = vld [vmem:[%s2307_s3 + $0x348] sm:$0xff] }
  0x9e   : > { %1339 = vst [vmem:[%s2347_s20 + $0x270] sm:$0xff] %v829_v45  ;;  %1340 = vst [vmem:[%s2347_s20 + $0x278] sm:$0xff] %v830_v46  ;;  %v330_v36 = vld [vmem:[%s2307_s3 + $0x350] sm:$0xff]  ;;  %v855_v37 = vadd.f32 %v2324_v11, %v328_v34  ;;  %v856_v38 = vadd.f32 %v2319_v8, %v329_v35  ;;  %v331_v40 = vld [vmem:[%s2307_s3 + $0x358] sm:$0xff] }
  0x9f   : > { %1341 = vst [vmem:[%s2347_s20 + $0x280] sm:$0xff] %v831_v50  ;;  %1342 = vst [vmem:[%s2347_s20 + $0x288] sm:$0xff] %v832_v51  ;;  %v857_v39 = vadd.f32 %v2321_v9, %v330_v36  ;;  %v332_v41 = vld [vmem:[%s2307_s3 + $0x360] sm:$0xff]  ;;  %v333_v42 = vld [vmem:[%s2307_s3 + $0x368] sm:$0xff]  ;;  %v858_v43 = vadd.f32 %v2324_v11, %v331_v40 }
  0xa0   : > { %1343 = vst [vmem:[%s2347_s20 + $0x290] sm:$0xff] %v833_v52  ;;  %1344 = vst [vmem:[%s2347_s20 + $0x298] sm:$0xff] %v834_v56  ;;  %v859_v44 = vadd.f32 %v2319_v8, %v332_v41  ;;  %v860_v45 = vadd.f32 %v2321_v9, %v333_v42  ;;  %v334_v46 = vld [vmem:[%s2307_s3 + $0x370] sm:$0xff]  ;;  %v335_v47 = vld [vmem:[%s2307_s3 + $0x378] sm:$0xff] }
  0xa1   : > { %1345 = vst [vmem:[%s2347_s20 + $0x2a0] sm:$0xff] %v835_v57  ;;  %1346 = vst [vmem:[%s2347_s20 + $0x2a8] sm:$0xff] %v836_v58  ;;  %v336_v48 = vld [vmem:[%s2307_s3 + $0x380] sm:$0xff]  ;;  %v861_v49 = vadd.f32 %v2324_v11, %v334_v46  ;;  %v862_v50 = vadd.f32 %v2319_v8, %v335_v47  ;;  %v337_v52 = vld [vmem:[%s2307_s3 + $0x388] sm:$0xff] }
  0xa2   : > { %1347 = vst [vmem:[%s2347_s20 + $0x2b0] sm:$0xff] %v837_v62  ;;  %1348 = vst [vmem:[%s2347_s20 + $0x2b8] sm:$0xff] %v838_v63  ;;  %v863_v51 = vadd.f32 %v2321_v9, %v336_v48  ;;  %v338_v53 = vld [vmem:[%s2307_s3 + $0x390] sm:$0xff]  ;;  %v339_v54 = vld [vmem:[%s2307_s3 + $0x398] sm:$0xff]  ;;  %v864_v55 = vadd.f32 %v2324_v11, %v337_v52 }
  0xa3   : > { %1349 = vst [vmem:[%s2347_s20 + $0x2c0] sm:$0xff] %v839_v0  ;;  %1350 = vst [vmem:[%s2347_s20 + $0x2c8] sm:$0xff] %v840_v4  ;;  %v865_v56 = vadd.f32 %v2319_v8, %v338_v53  ;;  %v866_v57 = vadd.f32 %v2321_v9, %v339_v54  ;;  %v340_v58 = vld [vmem:[%s2307_s3 + $0x3a0] sm:$0xff]  ;;  %v341_v59 = vld [vmem:[%s2307_s3 + $0x3a8] sm:$0xff] }
  0xa4   : > { %1351 = vst [vmem:[%s2347_s20 + $0x2d0] sm:$0xff] %v841_v5  ;;  %1352 = vst [vmem:[%s2347_s20 + $0x2d8] sm:$0xff] %v842_v6  ;;  %v342_v60 = vld [vmem:[%s2307_s3 + $0x3b0] sm:$0xff]  ;;  %v867_v61 = vadd.f32 %v2324_v11, %v340_v58  ;;  %v868_v62 = vadd.f32 %v2319_v8, %v341_v59  ;;  %v343_v0 = vld [vmem:[%s2307_s3 + $0x3b8] sm:$0xff] }
  0xa5   : > { %1353 = vst [vmem:[%s2347_s20 + $0x2e0] sm:$0xff] %v843_v13  ;;  %1354 = vst [vmem:[%s2347_s20 + $0x2e8] sm:$0xff] %v844_v14  ;;  %v869_v63 = vadd.f32 %v2321_v9, %v342_v60  ;;  %v344_v1 = vld [vmem:[%s2307_s3 + $0x3c0] sm:$0xff]  ;;  %v345_v2 = vld [vmem:[%s2307_s3 + $0x3c8] sm:$0xff]  ;;  %v870_v3 = vadd.f32 %v2324_v11, %v343_v0 }
  0xa6   : > { %1355 = vst [vmem:[%s2347_s20 + $0x2f0] sm:$0xff] %v845_v15  ;;  %1356 = vst [vmem:[%s2347_s20 + $0x2f8] sm:$0xff] %v846_v19  ;;  %v871_v4 = vadd.f32 %v2319_v8, %v344_v1  ;;  %v872_v5 = vadd.f32 %v2321_v9, %v345_v2  ;;  %v346_v6 = vld [vmem:[%s2307_s3 + $0x3d0] sm:$0xff]  ;;  %v347_v7 = vld [vmem:[%s2307_s3 + $0x3d8] sm:$0xff] }
  0xa7   : > { %1357 = vst [vmem:[%s2347_s20 + $0x300] sm:$0xff] %v847_v20  ;;  %1358 = vst [vmem:[%s2347_s20 + $0x308] sm:$0xff] %v848_v21  ;;  %v348_v10 = vld [vmem:[%s2307_s3 + $0x3e0] sm:$0xff]  ;;  %v873_v12 = vadd.f32 %v2324_v11, %v346_v6  ;;  %v874_v13 = vadd.f32 %v2319_v8, %v347_v7  ;;  %v349_v15 = vld [vmem:[%s2307_s3 + $0x3e8] sm:$0xff] }
  0xa8   : > { %1359 = vst [vmem:[%s2347_s20 + $0x310] sm:$0xff] %v849_v25  ;;  %1360 = vst [vmem:[%s2347_s20 + $0x318] sm:$0xff] %v850_v26  ;;  %v875_v14 = vadd.f32 %v2321_v9, %v348_v10  ;;  %v350_v16 = vld [vmem:[%s2307_s3 + $0x3f0] sm:$0xff]  ;;  %v351_v17 = vld [vmem:[%s2307_s3 + $0x3f8] sm:$0xff]  ;;  %v876_v18 = vadd.f32 %v2324_v11, %v349_v15 }
  0xa9   : > { %1361 = vst [vmem:[%s2347_s20 + $0x320] sm:$0xff] %v851_v27  ;;  %1362 = vst [vmem:[%s2347_s20 + $0x328] sm:$0xff] %v852_v31  ;;  %v877_v19 = vadd.f32 %v2319_v8, %v350_v16  ;;  %v878_v20 = vadd.f32 %v2321_v9, %v351_v17  ;;  %v352_v21 = vld [vmem:[%s2307_s3 + $0x400] sm:$0xff]  ;;  %v353_v22 = vld [vmem:[%s2307_s3 + $0x408] sm:$0xff] }
  0xaa   : > { %1363 = vst [vmem:[%s2347_s20 + $0x330] sm:$0xff] %v853_v32  ;;  %1364 = vst [vmem:[%s2347_s20 + $0x338] sm:$0xff] %v854_v33  ;;  %v354_v23 = vld [vmem:[%s2307_s3 + $0x410] sm:$0xff]  ;;  %v879_v24 = vadd.f32 %v2324_v11, %v352_v21  ;;  %v880_v25 = vadd.f32 %v2319_v8, %v353_v22  ;;  %v355_v27 = vld [vmem:[%s2307_s3 + $0x418] sm:$0xff] }
  0xab   : > { %1365 = vst [vmem:[%s2347_s20 + $0x340] sm:$0xff] %v855_v37  ;;  %1366 = vst [vmem:[%s2347_s20 + $0x348] sm:$0xff] %v856_v38  ;;  %v881_v26 = vadd.f32 %v2321_v9, %v354_v23  ;;  %v356_v28 = vld [vmem:[%s2307_s3 + $0x420] sm:$0xff]  ;;  %v357_v29 = vld [vmem:[%s2307_s3 + $0x428] sm:$0xff]  ;;  %v882_v30 = vadd.f32 %v2324_v11, %v355_v27 }
  0xac   : > { %1367 = vst [vmem:[%s2347_s20 + $0x350] sm:$0xff] %v857_v39  ;;  %1368 = vst [vmem:[%s2347_s20 + $0x358] sm:$0xff] %v858_v43  ;;  %v883_v31 = vadd.f32 %v2319_v8, %v356_v28  ;;  %v884_v32 = vadd.f32 %v2321_v9, %v357_v29  ;;  %v358_v33 = vld [vmem:[%s2307_s3 + $0x430] sm:$0xff]  ;;  %v359_v34 = vld [vmem:[%s2307_s3 + $0x438] sm:$0xff] }
  0xad   : > { %1369 = vst [vmem:[%s2347_s20 + $0x360] sm:$0xff] %v859_v44  ;;  %1370 = vst [vmem:[%s2347_s20 + $0x368] sm:$0xff] %v860_v45  ;;  %v360_v35 = vld [vmem:[%s2307_s3 + $0x440] sm:$0xff]  ;;  %v885_v36 = vadd.f32 %v2324_v11, %v358_v33  ;;  %v886_v37 = vadd.f32 %v2319_v8, %v359_v34  ;;  %v361_v39 = vld [vmem:[%s2307_s3 + $0x448] sm:$0xff] }
  0xae   : > { %1371 = vst [vmem:[%s2347_s20 + $0x370] sm:$0xff] %v861_v49  ;;  %1372 = vst [vmem:[%s2347_s20 + $0x378] sm:$0xff] %v862_v50  ;;  %v887_v38 = vadd.f32 %v2321_v9, %v360_v35  ;;  %v362_v40 = vld [vmem:[%s2307_s3 + $0x450] sm:$0xff]  ;;  %v363_v41 = vld [vmem:[%s2307_s3 + $0x458] sm:$0xff]  ;;  %v888_v42 = vadd.f32 %v2324_v11, %v361_v39 }
  0xaf   : > { %1373 = vst [vmem:[%s2347_s20 + $0x380] sm:$0xff] %v863_v51  ;;  %1374 = vst [vmem:[%s2347_s20 + $0x388] sm:$0xff] %v864_v55  ;;  %v889_v43 = vadd.f32 %v2319_v8, %v362_v40  ;;  %v890_v44 = vadd.f32 %v2321_v9, %v363_v41  ;;  %v364_v45 = vld [vmem:[%s2307_s3 + $0x460] sm:$0xff]  ;;  %v365_v46 = vld [vmem:[%s2307_s3 + $0x468] sm:$0xff] }
  0xb0   : > { %1375 = vst [vmem:[%s2347_s20 + $0x390] sm:$0xff] %v865_v56  ;;  %1376 = vst [vmem:[%s2347_s20 + $0x398] sm:$0xff] %v866_v57  ;;  %v366_v47 = vld [vmem:[%s2307_s3 + $0x470] sm:$0xff]  ;;  %v891_v48 = vadd.f32 %v2324_v11, %v364_v45  ;;  %v892_v49 = vadd.f32 %v2319_v8, %v365_v46  ;;  %v367_v51 = vld [vmem:[%s2307_s3 + $0x478] sm:$0xff] }
  0xb1   : > { %1377 = vst [vmem:[%s2347_s20 + $0x3a0] sm:$0xff] %v867_v61  ;;  %1378 = vst [vmem:[%s2347_s20 + $0x3a8] sm:$0xff] %v868_v62  ;;  %v893_v50 = vadd.f32 %v2321_v9, %v366_v47  ;;  %v368_v52 = vld [vmem:[%s2307_s3 + $0x480] sm:$0xff]  ;;  %v369_v53 = vld [vmem:[%s2307_s3 + $0x488] sm:$0xff]  ;;  %v894_v54 = vadd.f32 %v2324_v11, %v367_v51 }
  0xb2   : > { %1379 = vst [vmem:[%s2347_s20 + $0x3b0] sm:$0xff] %v869_v63  ;;  %1380 = vst [vmem:[%s2347_s20 + $0x3b8] sm:$0xff] %v870_v3  ;;  %v895_v55 = vadd.f32 %v2319_v8, %v368_v52  ;;  %v896_v56 = vadd.f32 %v2321_v9, %v369_v53  ;;  %v370_v57 = vld [vmem:[%s2307_s3 + $0x490] sm:$0xff]  ;;  %v371_v58 = vld [vmem:[%s2307_s3 + $0x498] sm:$0xff] }
  0xb3   : > { %1381 = vst [vmem:[%s2347_s20 + $0x3c0] sm:$0xff] %v871_v4  ;;  %1382 = vst [vmem:[%s2347_s20 + $0x3c8] sm:$0xff] %v872_v5  ;;  %v372_v59 = vld [vmem:[%s2307_s3 + $0x4a0] sm:$0xff]  ;;  %v897_v60 = vadd.f32 %v2324_v11, %v370_v57  ;;  %v898_v61 = vadd.f32 %v2319_v8, %v371_v58  ;;  %v373_v63 = vld [vmem:[%s2307_s3 + $0x4a8] sm:$0xff] }
  0xb4   : > { %1383 = vst [vmem:[%s2347_s20 + $0x3d0] sm:$0xff] %v873_v12  ;;  %1384 = vst [vmem:[%s2347_s20 + $0x3d8] sm:$0xff] %v874_v13  ;;  %v899_v62 = vadd.f32 %v2321_v9, %v372_v59  ;;  %v374_v0 = vld [vmem:[%s2307_s3 + $0x4b0] sm:$0xff]  ;;  %v375_v1 = vld [vmem:[%s2307_s3 + $0x4b8] sm:$0xff]  ;;  %v900_v2 = vadd.f32 %v2324_v11, %v373_v63 }
  0xb5   : > { %1385 = vst [vmem:[%s2347_s20 + $0x3e0] sm:$0xff] %v875_v14  ;;  %1386 = vst [vmem:[%s2347_s20 + $0x3e8] sm:$0xff] %v876_v18  ;;  %v901_v3 = vadd.f32 %v2319_v8, %v374_v0  ;;  %v902_v4 = vadd.f32 %v2321_v9, %v375_v1  ;;  %v376_v5 = vld [vmem:[%s2307_s3 + $0x4c0] sm:$0xff]  ;;  %v377_v6 = vld [vmem:[%s2307_s3 + $0x4c8] sm:$0xff] }
  0xb6   : > { %1387 = vst [vmem:[%s2347_s20 + $0x3f0] sm:$0xff] %v877_v19  ;;  %1388 = vst [vmem:[%s2347_s20 + $0x3f8] sm:$0xff] %v878_v20  ;;  %v378_v7 = vld [vmem:[%s2307_s3 + $0x4d0] sm:$0xff]  ;;  %v903_v10 = vadd.f32 %v2324_v11, %v376_v5  ;;  %v904_v12 = vadd.f32 %v2319_v8, %v377_v6  ;;  %v379_v14 = vld [vmem:[%s2307_s3 + $0x4d8] sm:$0xff] }
  0xb7   : > { %1389 = vst [vmem:[%s2347_s20 + $0x400] sm:$0xff] %v879_v24  ;;  %1390 = vst [vmem:[%s2347_s20 + $0x408] sm:$0xff] %v880_v25  ;;  %v905_v13 = vadd.f32 %v2321_v9, %v378_v7  ;;  %v380_v15 = vld [vmem:[%s2307_s3 + $0x4e0] sm:$0xff]  ;;  %v381_v16 = vld [vmem:[%s2307_s3 + $0x4e8] sm:$0xff]  ;;  %v906_v17 = vadd.f32 %v2324_v11, %v379_v14 }
  0xb8   : > { %1391 = vst [vmem:[%s2347_s20 + $0x410] sm:$0xff] %v881_v26  ;;  %1392 = vst [vmem:[%s2347_s20 + $0x418] sm:$0xff] %v882_v30  ;;  %v907_v18 = vadd.f32 %v2319_v8, %v380_v15  ;;  %v908_v19 = vadd.f32 %v2321_v9, %v381_v16  ;;  %v382_v20 = vld [vmem:[%s2307_s3 + $0x4f0] sm:$0xff]  ;;  %v383_v21 = vld [vmem:[%s2307_s3 + $0x4f8] sm:$0xff] }
  0xb9   : > { %1393 = vst [vmem:[%s2347_s20 + $0x420] sm:$0xff] %v883_v31  ;;  %1394 = vst [vmem:[%s2347_s20 + $0x428] sm:$0xff] %v884_v32  ;;  %v384_v22 = vld [vmem:[%s2307_s3 + $0x500] sm:$0xff]  ;;  %v909_v23 = vadd.f32 %v2324_v11, %v382_v20  ;;  %v910_v24 = vadd.f32 %v2319_v8, %v383_v21  ;;  %v385_v26 = vld [vmem:[%s2307_s3 + $0x508] sm:$0xff] }
  0xba   : > { %1395 = vst [vmem:[%s2347_s20 + $0x430] sm:$0xff] %v885_v36  ;;  %1396 = vst [vmem:[%s2347_s20 + $0x438] sm:$0xff] %v886_v37  ;;  %v911_v25 = vadd.f32 %v2321_v9, %v384_v22  ;;  %v386_v27 = vld [vmem:[%s2307_s3 + $0x510] sm:$0xff]  ;;  %v387_v28 = vld [vmem:[%s2307_s3 + $0x518] sm:$0xff]  ;;  %v912_v29 = vadd.f32 %v2324_v11, %v385_v26 }
  0xbb   : > { %1397 = vst [vmem:[%s2347_s20 + $0x440] sm:$0xff] %v887_v38  ;;  %1398 = vst [vmem:[%s2347_s20 + $0x448] sm:$0xff] %v888_v42  ;;  %v913_v30 = vadd.f32 %v2319_v8, %v386_v27  ;;  %v914_v31 = vadd.f32 %v2321_v9, %v387_v28  ;;  %v388_v32 = vld [vmem:[%s2307_s3 + $0x520] sm:$0xff]  ;;  %v389_v33 = vld [vmem:[%s2307_s3 + $0x528] sm:$0xff] }
  0xbc   : > { %1399 = vst [vmem:[%s2347_s20 + $0x450] sm:$0xff] %v889_v43  ;;  %1400 = vst [vmem:[%s2347_s20 + $0x458] sm:$0xff] %v890_v44  ;;  %v390_v34 = vld [vmem:[%s2307_s3 + $0x530] sm:$0xff]  ;;  %v915_v35 = vadd.f32 %v2324_v11, %v388_v32  ;;  %v916_v36 = vadd.f32 %v2319_v8, %v389_v33  ;;  %v391_v38 = vld [vmem:[%s2307_s3 + $0x538] sm:$0xff] }
  0xbd   : > { %1401 = vst [vmem:[%s2347_s20 + $0x460] sm:$0xff] %v891_v48  ;;  %1402 = vst [vmem:[%s2347_s20 + $0x468] sm:$0xff] %v892_v49  ;;  %v917_v37 = vadd.f32 %v2321_v9, %v390_v34  ;;  %v392_v39 = vld [vmem:[%s2307_s3 + $0x540] sm:$0xff]  ;;  %v393_v40 = vld [vmem:[%s2307_s3 + $0x548] sm:$0xff]  ;;  %v918_v41 = vadd.f32 %v2324_v11, %v391_v38 }
  0xbe   : > { %1403 = vst [vmem:[%s2347_s20 + $0x470] sm:$0xff] %v893_v50  ;;  %1404 = vst [vmem:[%s2347_s20 + $0x478] sm:$0xff] %v894_v54  ;;  %v919_v42 = vadd.f32 %v2319_v8, %v392_v39  ;;  %v920_v43 = vadd.f32 %v2321_v9, %v393_v40  ;;  %v394_v44 = vld [vmem:[%s2307_s3 + $0x550] sm:$0xff]  ;;  %v395_v45 = vld [vmem:[%s2307_s3 + $0x558] sm:$0xff] }
  0xbf   : > { %1405 = vst [vmem:[%s2347_s20 + $0x480] sm:$0xff] %v895_v55  ;;  %1406 = vst [vmem:[%s2347_s20 + $0x488] sm:$0xff] %v896_v56  ;;  %v396_v46 = vld [vmem:[%s2307_s3 + $0x560] sm:$0xff]  ;;  %v921_v47 = vadd.f32 %v2324_v11, %v394_v44  ;;  %v922_v48 = vadd.f32 %v2319_v8, %v395_v45  ;;  %v397_v50 = vld [vmem:[%s2307_s3 + $0x568] sm:$0xff] }
  0xc0   : > { %1407 = vst [vmem:[%s2347_s20 + $0x490] sm:$0xff] %v897_v60  ;;  %1408 = vst [vmem:[%s2347_s20 + $0x498] sm:$0xff] %v898_v61  ;;  %v923_v49 = vadd.f32 %v2321_v9, %v396_v46  ;;  %v398_v51 = vld [vmem:[%s2307_s3 + $0x570] sm:$0xff]  ;;  %v399_v52 = vld [vmem:[%s2307_s3 + $0x578] sm:$0xff]  ;;  %v924_v53 = vadd.f32 %v2324_v11, %v397_v50 }
  0xc1   : > { %1409 = vst [vmem:[%s2347_s20 + $0x4a0] sm:$0xff] %v899_v62  ;;  %1410 = vst [vmem:[%s2347_s20 + $0x4a8] sm:$0xff] %v900_v2  ;;  %v925_v54 = vadd.f32 %v2319_v8, %v398_v51  ;;  %v926_v55 = vadd.f32 %v2321_v9, %v399_v52  ;;  %v400_v56 = vld [vmem:[%s2307_s3 + $0x580] sm:$0xff]  ;;  %v401_v57 = vld [vmem:[%s2307_s3 + $0x588] sm:$0xff] }
  0xc2   : > { %1411 = vst [vmem:[%s2347_s20 + $0x4b0] sm:$0xff] %v901_v3  ;;  %1412 = vst [vmem:[%s2347_s20 + $0x4b8] sm:$0xff] %v902_v4  ;;  %v402_v58 = vld [vmem:[%s2307_s3 + $0x590] sm:$0xff]  ;;  %v927_v59 = vadd.f32 %v2324_v11, %v400_v56  ;;  %v928_v60 = vadd.f32 %v2319_v8, %v401_v57  ;;  %v403_v62 = vld [vmem:[%s2307_s3 + $0x598] sm:$0xff] }
  0xc3   : > { %1413 = vst [vmem:[%s2347_s20 + $0x4c0] sm:$0xff] %v903_v10  ;;  %1414 = vst [vmem:[%s2347_s20 + $0x4c8] sm:$0xff] %v904_v12  ;;  %v929_v61 = vadd.f32 %v2321_v9, %v402_v58  ;;  %v404_v63 = vld [vmem:[%s2307_s3 + $0x5a0] sm:$0xff]  ;;  %v405_v0 = vld [vmem:[%s2307_s3 + $0x5a8] sm:$0xff]  ;;  %v930_v1 = vadd.f32 %v2324_v11, %v403_v62 }
  0xc4   : > { %1415 = vst [vmem:[%s2347_s20 + $0x4d0] sm:$0xff] %v905_v13  ;;  %1416 = vst [vmem:[%s2347_s20 + $0x4d8] sm:$0xff] %v906_v17  ;;  %v931_v2 = vadd.f32 %v2319_v8, %v404_v63  ;;  %v932_v3 = vadd.f32 %v2321_v9, %v405_v0  ;;  %v406_v4 = vld [vmem:[%s2307_s3 + $0x5b0] sm:$0xff]  ;;  %v407_v5 = vld [vmem:[%s2307_s3 + $0x5b8] sm:$0xff] }
  0xc5   : > { %1417 = vst [vmem:[%s2347_s20 + $0x4e0] sm:$0xff] %v907_v18  ;;  %1418 = vst [vmem:[%s2347_s20 + $0x4e8] sm:$0xff] %v908_v19  ;;  %v408_v6 = vld [vmem:[%s2307_s3 + $0x5c0] sm:$0xff]  ;;  %v933_v7 = vadd.f32 %v2324_v11, %v406_v4  ;;  %v934_v10 = vadd.f32 %v2319_v8, %v407_v5  ;;  %v409_v13 = vld [vmem:[%s2307_s3 + $0x5c8] sm:$0xff] }
  0xc6   : > { %1419 = vst [vmem:[%s2347_s20 + $0x4f0] sm:$0xff] %v909_v23  ;;  %1420 = vst [vmem:[%s2347_s20 + $0x4f8] sm:$0xff] %v910_v24  ;;  %v935_v12 = vadd.f32 %v2321_v9, %v408_v6  ;;  %v410_v14 = vld [vmem:[%s2307_s3 + $0x5d0] sm:$0xff]  ;;  %v411_v15 = vld [vmem:[%s2307_s3 + $0x5d8] sm:$0xff]  ;;  %v936_v16 = vadd.f32 %v2324_v11, %v409_v13 }
  0xc7   : > { %1421 = vst [vmem:[%s2347_s20 + $0x500] sm:$0xff] %v911_v25  ;;  %1422 = vst [vmem:[%s2347_s20 + $0x508] sm:$0xff] %v912_v29  ;;  %v937_v17 = vadd.f32 %v2319_v8, %v410_v14  ;;  %v938_v18 = vadd.f32 %v2321_v9, %v411_v15  ;;  %v412_v19 = vld [vmem:[%s2307_s3 + $0x5e0] sm:$0xff]  ;;  %v413_v20 = vld [vmem:[%s2307_s3 + $0x5e8] sm:$0xff] }
  0xc8   : > { %1423 = vst [vmem:[%s2347_s20 + $0x510] sm:$0xff] %v913_v30  ;;  %1424 = vst [vmem:[%s2347_s20 + $0x518] sm:$0xff] %v914_v31  ;;  %v414_v21 = vld [vmem:[%s2307_s3 + $0x5f0] sm:$0xff]  ;;  %v939_v22 = vadd.f32 %v2324_v11, %v412_v19  ;;  %v940_v23 = vadd.f32 %v2319_v8, %v413_v20  ;;  %v415_v25 = vld [vmem:[%s2307_s3 + $0x5f8] sm:$0xff] }
  0xc9   : > { %1425 = vst [vmem:[%s2347_s20 + $0x520] sm:$0xff] %v915_v35  ;;  %1426 = vst [vmem:[%s2347_s20 + $0x528] sm:$0xff] %v916_v36  ;;  %v941_v24 = vadd.f32 %v2321_v9, %v414_v21  ;;  %v416_v26 = vld [vmem:[%s2307_s3 + $0x600] sm:$0xff]  ;;  %v417_v27 = vld [vmem:[%s2307_s3 + $0x608] sm:$0xff]  ;;  %v942_v28 = vadd.f32 %v2324_v11, %v415_v25 }
  0xca   : > { %1427 = vst [vmem:[%s2347_s20 + $0x530] sm:$0xff] %v917_v37  ;;  %1428 = vst [vmem:[%s2347_s20 + $0x538] sm:$0xff] %v918_v41  ;;  %v943_v29 = vadd.f32 %v2319_v8, %v416_v26  ;;  %v944_v30 = vadd.f32 %v2321_v9, %v417_v27  ;;  %v418_v31 = vld [vmem:[%s2307_s3 + $0x610] sm:$0xff]  ;;  %v419_v32 = vld [vmem:[%s2307_s3 + $0x618] sm:$0xff] }
  0xcb   : > { %1429 = vst [vmem:[%s2347_s20 + $0x540] sm:$0xff] %v919_v42  ;;  %1430 = vst [vmem:[%s2347_s20 + $0x548] sm:$0xff] %v920_v43  ;;  %v420_v33 = vld [vmem:[%s2307_s3 + $0x620] sm:$0xff]  ;;  %v945_v34 = vadd.f32 %v2324_v11, %v418_v31  ;;  %v946_v35 = vadd.f32 %v2319_v8, %v419_v32  ;;  %v421_v37 = vld [vmem:[%s2307_s3 + $0x628] sm:$0xff] }
  0xcc   : > { %1431 = vst [vmem:[%s2347_s20 + $0x550] sm:$0xff] %v921_v47  ;;  %1432 = vst [vmem:[%s2347_s20 + $0x558] sm:$0xff] %v922_v48  ;;  %v947_v36 = vadd.f32 %v2321_v9, %v420_v33  ;;  %v422_v38 = vld [vmem:[%s2307_s3 + $0x630] sm:$0xff]  ;;  %v423_v39 = vld [vmem:[%s2307_s3 + $0x638] sm:$0xff]  ;;  %v948_v40 = vadd.f32 %v2324_v11, %v421_v37 }
  0xcd   : > { %1433 = vst [vmem:[%s2347_s20 + $0x560] sm:$0xff] %v923_v49  ;;  %1434 = vst [vmem:[%s2347_s20 + $0x568] sm:$0xff] %v924_v53  ;;  %v949_v41 = vadd.f32 %v2319_v8, %v422_v38  ;;  %v950_v42 = vadd.f32 %v2321_v9, %v423_v39  ;;  %v424_v43 = vld [vmem:[%s2307_s3 + $0x640] sm:$0xff]  ;;  %v425_v44 = vld [vmem:[%s2307_s3 + $0x648] sm:$0xff] }
  0xce   : > { %1435 = vst [vmem:[%s2347_s20 + $0x570] sm:$0xff] %v925_v54  ;;  %1436 = vst [vmem:[%s2347_s20 + $0x578] sm:$0xff] %v926_v55  ;;  %v426_v45 = vld [vmem:[%s2307_s3 + $0x650] sm:$0xff]  ;;  %v951_v46 = vadd.f32 %v2324_v11, %v424_v43  ;;  %v952_v47 = vadd.f32 %v2319_v8, %v425_v44  ;;  %v427_v49 = vld [vmem:[%s2307_s3 + $0x658] sm:$0xff] }
  0xcf   : > { %1437 = vst [vmem:[%s2347_s20 + $0x580] sm:$0xff] %v927_v59  ;;  %1438 = vst [vmem:[%s2347_s20 + $0x588] sm:$0xff] %v928_v60  ;;  %v953_v48 = vadd.f32 %v2321_v9, %v426_v45  ;;  %v428_v50 = vld [vmem:[%s2307_s3 + $0x660] sm:$0xff]  ;;  %v429_v51 = vld [vmem:[%s2307_s3 + $0x668] sm:$0xff]  ;;  %v954_v52 = vadd.f32 %v2324_v11, %v427_v49 }
  0xd0   : > { %1439 = vst [vmem:[%s2347_s20 + $0x590] sm:$0xff] %v929_v61  ;;  %1440 = vst [vmem:[%s2347_s20 + $0x598] sm:$0xff] %v930_v1  ;;  %v955_v53 = vadd.f32 %v2319_v8, %v428_v50  ;;  %v956_v54 = vadd.f32 %v2321_v9, %v429_v51  ;;  %v430_v55 = vld [vmem:[%s2307_s3 + $0x670] sm:$0xff]  ;;  %v431_v56 = vld [vmem:[%s2307_s3 + $0x678] sm:$0xff] }
  0xd1   : > { %1441 = vst [vmem:[%s2347_s20 + $0x5a0] sm:$0xff] %v931_v2  ;;  %1442 = vst [vmem:[%s2347_s20 + $0x5a8] sm:$0xff] %v932_v3  ;;  %v432_v57 = vld [vmem:[%s2307_s3 + $0x680] sm:$0xff]  ;;  %v957_v58 = vadd.f32 %v2324_v11, %v430_v55  ;;  %v958_v59 = vadd.f32 %v2319_v8, %v431_v56  ;;  %v433_v61 = vld [vmem:[%s2307_s3 + $0x688] sm:$0xff] }
  0xd2   : > { %1443 = vst [vmem:[%s2347_s20 + $0x5b0] sm:$0xff] %v933_v7  ;;  %1444 = vst [vmem:[%s2347_s20 + $0x5b8] sm:$0xff] %v934_v10  ;;  %v959_v60 = vadd.f32 %v2321_v9, %v432_v57  ;;  %v434_v62 = vld [vmem:[%s2307_s3 + $0x690] sm:$0xff]  ;;  %v435_v63 = vld [vmem:[%s2307_s3 + $0x698] sm:$0xff]  ;;  %v960_v0 = vadd.f32 %v2324_v11, %v433_v61 }
  0xd3   : > { %1445 = vst [vmem:[%s2347_s20 + $0x5c0] sm:$0xff] %v935_v12  ;;  %1446 = vst [vmem:[%s2347_s20 + $0x5c8] sm:$0xff] %v936_v16  ;;  %v961_v1 = vadd.f32 %v2319_v8, %v434_v62  ;;  %v962_v2 = vadd.f32 %v2321_v9, %v435_v63  ;;  %v436_v3 = vld [vmem:[%s2307_s3 + $0x6a0] sm:$0xff]  ;;  %v437_v4 = vld [vmem:[%s2307_s3 + $0x6a8] sm:$0xff] }
  0xd4   : > { %1447 = vst [vmem:[%s2347_s20 + $0x5d0] sm:$0xff] %v937_v17  ;;  %1448 = vst [vmem:[%s2347_s20 + $0x5d8] sm:$0xff] %v938_v18  ;;  %v438_v5 = vld [vmem:[%s2307_s3 + $0x6b0] sm:$0xff]  ;;  %v963_v6 = vadd.f32 %v2324_v11, %v436_v3  ;;  %v964_v7 = vadd.f32 %v2319_v8, %v437_v4  ;;  %v439_v12 = vld [vmem:[%s2307_s3 + $0x6b8] sm:$0xff] }
  0xd5   : > { %1449 = vst [vmem:[%s2347_s20 + $0x5e0] sm:$0xff] %v939_v22  ;;  %1450 = vst [vmem:[%s2347_s20 + $0x5e8] sm:$0xff] %v940_v23  ;;  %v965_v10 = vadd.f32 %v2321_v9, %v438_v5  ;;  %v440_v13 = vld [vmem:[%s2307_s3 + $0x6c0] sm:$0xff]  ;;  %v441_v14 = vld [vmem:[%s2307_s3 + $0x6c8] sm:$0xff]  ;;  %v966_v15 = vadd.f32 %v2324_v11, %v439_v12 }
  0xd6   : > { %1451 = vst [vmem:[%s2347_s20 + $0x5f0] sm:$0xff] %v941_v24  ;;  %1452 = vst [vmem:[%s2347_s20 + $0x5f8] sm:$0xff] %v942_v28  ;;  %v967_v16 = vadd.f32 %v2319_v8, %v440_v13  ;;  %v968_v17 = vadd.f32 %v2321_v9, %v441_v14  ;;  %v442_v18 = vld [vmem:[%s2307_s3 + $0x6d0] sm:$0xff]  ;;  %v443_v19 = vld [vmem:[%s2307_s3 + $0x6d8] sm:$0xff] }
  0xd7   : > { %1453 = vst [vmem:[%s2347_s20 + $0x600] sm:$0xff] %v943_v29  ;;  %1454 = vst [vmem:[%s2347_s20 + $0x608] sm:$0xff] %v944_v30  ;;  %v444_v20 = vld [vmem:[%s2307_s3 + $0x6e0] sm:$0xff]  ;;  %v969_v21 = vadd.f32 %v2324_v11, %v442_v18  ;;  %v970_v22 = vadd.f32 %v2319_v8, %v443_v19  ;;  %v445_v24 = vld [vmem:[%s2307_s3 + $0x6e8] sm:$0xff] }
  0xd8   : > { %1455 = vst [vmem:[%s2347_s20 + $0x610] sm:$0xff] %v945_v34  ;;  %1456 = vst [vmem:[%s2347_s20 + $0x618] sm:$0xff] %v946_v35  ;;  %v971_v23 = vadd.f32 %v2321_v9, %v444_v20  ;;  %v446_v25 = vld [vmem:[%s2307_s3 + $0x6f0] sm:$0xff]  ;;  %v447_v26 = vld [vmem:[%s2307_s3 + $0x6f8] sm:$0xff]  ;;  %v972_v27 = vadd.f32 %v2324_v11, %v445_v24 }
  0xd9   : > { %1457 = vst [vmem:[%s2347_s20 + $0x620] sm:$0xff] %v947_v36  ;;  %1458 = vst [vmem:[%s2347_s20 + $0x628] sm:$0xff] %v948_v40  ;;  %v973_v28 = vadd.f32 %v2319_v8, %v446_v25  ;;  %v974_v29 = vadd.f32 %v2321_v9, %v447_v26  ;;  %v448_v30 = vld [vmem:[%s2307_s3 + $0x700] sm:$0xff]  ;;  %v449_v31 = vld [vmem:[%s2307_s3 + $0x708] sm:$0xff] }
  0xda   : > { %1459 = vst [vmem:[%s2347_s20 + $0x630] sm:$0xff] %v949_v41  ;;  %1460 = vst [vmem:[%s2347_s20 + $0x638] sm:$0xff] %v950_v42  ;;  %v450_v32 = vld [vmem:[%s2307_s3 + $0x710] sm:$0xff]  ;;  %v975_v33 = vadd.f32 %v2324_v11, %v448_v30  ;;  %v976_v34 = vadd.f32 %v2319_v8, %v449_v31  ;;  %v451_v36 = vld [vmem:[%s2307_s3 + $0x718] sm:$0xff] }
  0xdb   : > { %1461 = vst [vmem:[%s2347_s20 + $0x640] sm:$0xff] %v951_v46  ;;  %1462 = vst [vmem:[%s2347_s20 + $0x648] sm:$0xff] %v952_v47  ;;  %v977_v35 = vadd.f32 %v2321_v9, %v450_v32  ;;  %v452_v37 = vld [vmem:[%s2307_s3 + $0x720] sm:$0xff]  ;;  %v453_v38 = vld [vmem:[%s2307_s3 + $0x728] sm:$0xff]  ;;  %v978_v39 = vadd.f32 %v2324_v11, %v451_v36 }
  0xdc   : > { %1463 = vst [vmem:[%s2347_s20 + $0x650] sm:$0xff] %v953_v48  ;;  %1464 = vst [vmem:[%s2347_s20 + $0x658] sm:$0xff] %v954_v52  ;;  %v979_v40 = vadd.f32 %v2319_v8, %v452_v37  ;;  %v980_v41 = vadd.f32 %v2321_v9, %v453_v38  ;;  %v454_v42 = vld [vmem:[%s2307_s3 + $0x730] sm:$0xff]  ;;  %v455_v43 = vld [vmem:[%s2307_s3 + $0x738] sm:$0xff] }
  0xdd   : > { %1465 = vst [vmem:[%s2347_s20 + $0x660] sm:$0xff] %v955_v53  ;;  %1466 = vst [vmem:[%s2347_s20 + $0x668] sm:$0xff] %v956_v54  ;;  %v456_v44 = vld [vmem:[%s2307_s3 + $0x740] sm:$0xff]  ;;  %v981_v45 = vadd.f32 %v2324_v11, %v454_v42  ;;  %v982_v46 = vadd.f32 %v2319_v8, %v455_v43  ;;  %v457_v48 = vld [vmem:[%s2307_s3 + $0x748] sm:$0xff] }
  0xde   : > { %1467 = vst [vmem:[%s2347_s20 + $0x670] sm:$0xff] %v957_v58  ;;  %1468 = vst [vmem:[%s2347_s20 + $0x678] sm:$0xff] %v958_v59  ;;  %v983_v47 = vadd.f32 %v2321_v9, %v456_v44  ;;  %v458_v49 = vld [vmem:[%s2307_s3 + $0x750] sm:$0xff]  ;;  %v459_v50 = vld [vmem:[%s2307_s3 + $0x758] sm:$0xff]  ;;  %v984_v51 = vadd.f32 %v2324_v11, %v457_v48 }
  0xdf   : > { %1469 = vst [vmem:[%s2347_s20 + $0x680] sm:$0xff] %v959_v60  ;;  %1470 = vst [vmem:[%s2347_s20 + $0x688] sm:$0xff] %v960_v0  ;;  %v985_v52 = vadd.f32 %v2319_v8, %v458_v49  ;;  %v986_v53 = vadd.f32 %v2321_v9, %v459_v50  ;;  %v460_v54 = vld [vmem:[%s2307_s3 + $0x760] sm:$0xff]  ;;  %v461_v55 = vld [vmem:[%s2307_s3 + $0x768] sm:$0xff] }
  0xe0   : > { %1471 = vst [vmem:[%s2347_s20 + $0x690] sm:$0xff] %v961_v1  ;;  %1472 = vst [vmem:[%s2347_s20 + $0x698] sm:$0xff] %v962_v2  ;;  %v462_v56 = vld [vmem:[%s2307_s3 + $0x770] sm:$0xff]  ;;  %v987_v57 = vadd.f32 %v2324_v11, %v460_v54  ;;  %v988_v58 = vadd.f32 %v2319_v8, %v461_v55  ;;  %v463_v60 = vld [vmem:[%s2307_s3 + $0x778] sm:$0xff] }
  0xe1   : > { %1473 = vst [vmem:[%s2347_s20 + $0x6a0] sm:$0xff] %v963_v6  ;;  %1474 = vst [vmem:[%s2347_s20 + $0x6a8] sm:$0xff] %v964_v7  ;;  %v989_v59 = vadd.f32 %v2321_v9, %v462_v56  ;;  %v464_v61 = vld [vmem:[%s2307_s3 + $0x780] sm:$0xff]  ;;  %v465_v62 = vld [vmem:[%s2307_s3 + $0x788] sm:$0xff]  ;;  %v990_v63 = vadd.f32 %v2324_v11, %v463_v60 }
  0xe2   : > { %1475 = vst [vmem:[%s2347_s20 + $0x6b0] sm:$0xff] %v965_v10  ;;  %1476 = vst [vmem:[%s2347_s20 + $0x6b8] sm:$0xff] %v966_v15  ;;  %v991_v0 = vadd.f32 %v2319_v8, %v464_v61  ;;  %v992_v1 = vadd.f32 %v2321_v9, %v465_v62  ;;  %v466_v2 = vld [vmem:[%s2307_s3 + $0x790] sm:$0xff]  ;;  %v467_v3 = vld [vmem:[%s2307_s3 + $0x798] sm:$0xff] }
  0xe3   : > { %1477 = vst [vmem:[%s2347_s20 + $0x6c0] sm:$0xff] %v967_v16  ;;  %1478 = vst [vmem:[%s2347_s20 + $0x6c8] sm:$0xff] %v968_v17  ;;  %v468_v4 = vld [vmem:[%s2307_s3 + $0x7a0] sm:$0xff]  ;;  %v993_v5 = vadd.f32 %v2324_v11, %v466_v2  ;;  %v994_v6 = vadd.f32 %v2319_v8, %v467_v3  ;;  %v469_v10 = vld [vmem:[%s2307_s3 + $0x7a8] sm:$0xff] }
  0xe4   : > { %1479 = vst [vmem:[%s2347_s20 + $0x6d0] sm:$0xff] %v969_v21  ;;  %1480 = vst [vmem:[%s2347_s20 + $0x6d8] sm:$0xff] %v970_v22  ;;  %v995_v7 = vadd.f32 %v2321_v9, %v468_v4  ;;  %v470_v12 = vld [vmem:[%s2307_s3 + $0x7b0] sm:$0xff]  ;;  %v471_v13 = vld [vmem:[%s2307_s3 + $0x7b8] sm:$0xff]  ;;  %v996_v14 = vadd.f32 %v2324_v11, %v469_v10 }
  0xe5   : > { %1481 = vst [vmem:[%s2347_s20 + $0x6e0] sm:$0xff] %v971_v23  ;;  %1482 = vst [vmem:[%s2347_s20 + $0x6e8] sm:$0xff] %v972_v27  ;;  %v997_v15 = vadd.f32 %v2319_v8, %v470_v12  ;;  %v998_v16 = vadd.f32 %v2321_v9, %v471_v13  ;;  %v472_v17 = vld [vmem:[%s2307_s3 + $0x7c0] sm:$0xff]  ;;  %v473_v18 = vld [vmem:[%s2307_s3 + $0x7c8] sm:$0xff] }
  0xe6   : > { %1483 = vst [vmem:[%s2347_s20 + $0x6f0] sm:$0xff] %v973_v28  ;;  %1484 = vst [vmem:[%s2347_s20 + $0x6f8] sm:$0xff] %v974_v29  ;;  %v474_v19 = vld [vmem:[%s2307_s3 + $0x7d0] sm:$0xff]  ;;  %v999_v20 = vadd.f32 %v2324_v11, %v472_v17  ;;  %v1000_v21 = vadd.f32 %v2319_v8, %v473_v18  ;;  %v475_v23 = vld [vmem:[%s2307_s3 + $0x7d8] sm:$0xff] }
  0xe7   : > { %1485 = vst [vmem:[%s2347_s20 + $0x700] sm:$0xff] %v975_v33  ;;  %1486 = vst [vmem:[%s2347_s20 + $0x708] sm:$0xff] %v976_v34  ;;  %v1001_v22 = vadd.f32 %v2321_v9, %v474_v19  ;;  %v476_v24 = vld [vmem:[%s2307_s3 + $0x7e0] sm:$0xff]  ;;  %v477_v25 = vld [vmem:[%s2307_s3 + $0x7e8] sm:$0xff]  ;;  %v1002_v26 = vadd.f32 %v2324_v11, %v475_v23 }
  0xe8   : > { %1487 = vst [vmem:[%s2347_s20 + $0x710] sm:$0xff] %v977_v35  ;;  %1488 = vst [vmem:[%s2347_s20 + $0x718] sm:$0xff] %v978_v39  ;;  %v1003_v27 = vadd.f32 %v2319_v8, %v476_v24  ;;  %v1004_v28 = vadd.f32 %v2321_v9, %v477_v25  ;;  %v478_v29 = vld [vmem:[%s2307_s3 + $0x7f0] sm:$0xff]  ;;  %v479_v30 = vld [vmem:[%s2307_s3 + $0x7f8] sm:$0xff] }
  0xe9   : > { %1489 = vst [vmem:[%s2347_s20 + $0x720] sm:$0xff] %v979_v40  ;;  %1490 = vst [vmem:[%s2347_s20 + $0x728] sm:$0xff] %v980_v41  ;;  %v480_v31 = vld [vmem:[%s2307_s3 + $0x800] sm:$0xff]  ;;  %v1005_v32 = vadd.f32 %v2324_v11, %v478_v29  ;;  %v1006_v33 = vadd.f32 %v2319_v8, %v479_v30  ;;  %v481_v35 = vld [vmem:[%s2307_s3 + $0x808] sm:$0xff] }
  0xea   : > { %1491 = vst [vmem:[%s2347_s20 + $0x730] sm:$0xff] %v981_v45  ;;  %1492 = vst [vmem:[%s2347_s20 + $0x738] sm:$0xff] %v982_v46  ;;  %v1007_v34 = vadd.f32 %v2321_v9, %v480_v31  ;;  %v482_v36 = vld [vmem:[%s2307_s3 + $0x810] sm:$0xff]  ;;  %v483_v37 = vld [vmem:[%s2307_s3 + $0x818] sm:$0xff]  ;;  %v1008_v38 = vadd.f32 %v2324_v11, %v481_v35 }
  0xeb   : > { %1493 = vst [vmem:[%s2347_s20 + $0x740] sm:$0xff] %v983_v47  ;;  %1494 = vst [vmem:[%s2347_s20 + $0x748] sm:$0xff] %v984_v51  ;;  %v1009_v39 = vadd.f32 %v2319_v8, %v482_v36  ;;  %v1010_v40 = vadd.f32 %v2321_v9, %v483_v37  ;;  %v484_v41 = vld [vmem:[%s2307_s3 + $0x820] sm:$0xff]  ;;  %v485_v42 = vld [vmem:[%s2307_s3 + $0x828] sm:$0xff] }
  0xec   : > { %1495 = vst [vmem:[%s2347_s20 + $0x750] sm:$0xff] %v985_v52  ;;  %1496 = vst [vmem:[%s2347_s20 + $0x758] sm:$0xff] %v986_v53  ;;  %v486_v43 = vld [vmem:[%s2307_s3 + $0x830] sm:$0xff]  ;;  %v1011_v44 = vadd.f32 %v2324_v11, %v484_v41  ;;  %v1012_v45 = vadd.f32 %v2319_v8, %v485_v42  ;;  %v487_v47 = vld [vmem:[%s2307_s3 + $0x838] sm:$0xff] }
  0xed   : > { %1497 = vst [vmem:[%s2347_s20 + $0x760] sm:$0xff] %v987_v57  ;;  %1498 = vst [vmem:[%s2347_s20 + $0x768] sm:$0xff] %v988_v58  ;;  %v1013_v46 = vadd.f32 %v2321_v9, %v486_v43  ;;  %v488_v48 = vld [vmem:[%s2307_s3 + $0x840] sm:$0xff]  ;;  %v489_v49 = vld [vmem:[%s2307_s3 + $0x848] sm:$0xff]  ;;  %v1014_v50 = vadd.f32 %v2324_v11, %v487_v47 }
  0xee   : > { %1499 = vst [vmem:[%s2347_s20 + $0x770] sm:$0xff] %v989_v59  ;;  %1500 = vst [vmem:[%s2347_s20 + $0x778] sm:$0xff] %v990_v63  ;;  %v1015_v51 = vadd.f32 %v2319_v8, %v488_v48  ;;  %v1016_v52 = vadd.f32 %v2321_v9, %v489_v49  ;;  %v490_v53 = vld [vmem:[%s2307_s3 + $0x850] sm:$0xff]  ;;  %v491_v54 = vld [vmem:[%s2307_s3 + $0x858] sm:$0xff] }
  0xef   : > { %1501 = vst [vmem:[%s2347_s20 + $0x780] sm:$0xff] %v991_v0  ;;  %1502 = vst [vmem:[%s2347_s20 + $0x788] sm:$0xff] %v992_v1  ;;  %v492_v55 = vld [vmem:[%s2307_s3 + $0x860] sm:$0xff]  ;;  %v1017_v56 = vadd.f32 %v2324_v11, %v490_v53  ;;  %v1018_v57 = vadd.f32 %v2319_v8, %v491_v54  ;;  %v493_v59 = vld [vmem:[%s2307_s3 + $0x868] sm:$0xff] }
  0xf0   : > { %1503 = vst [vmem:[%s2347_s20 + $0x790] sm:$0xff] %v993_v5  ;;  %1504 = vst [vmem:[%s2347_s20 + $0x798] sm:$0xff] %v994_v6  ;;  %v1019_v58 = vadd.f32 %v2321_v9, %v492_v55  ;;  %v494_v60 = vld [vmem:[%s2307_s3 + $0x870] sm:$0xff]  ;;  %v495_v61 = vld [vmem:[%s2307_s3 + $0x878] sm:$0xff]  ;;  %v1020_v62 = vadd.f32 %v2324_v11, %v493_v59 }
  0xf1   : > { %1505 = vst [vmem:[%s2347_s20 + $0x7a0] sm:$0xff] %v995_v7  ;;  %1506 = vst [vmem:[%s2347_s20 + $0x7a8] sm:$0xff] %v996_v14  ;;  %v1021_v63 = vadd.f32 %v2319_v8, %v494_v60  ;;  %v1022_v0 = vadd.f32 %v2321_v9, %v495_v61  ;;  %v496_v1 = vld [vmem:[%s2307_s3 + $0x880] sm:$0xff]  ;;  %v497_v2 = vld [vmem:[%s2307_s3 + $0x888] sm:$0xff] }
  0xf2   : > { %1507 = vst [vmem:[%s2347_s20 + $0x7b0] sm:$0xff] %v997_v15  ;;  %1508 = vst [vmem:[%s2347_s20 + $0x7b8] sm:$0xff] %v998_v16  ;;  %v498_v3 = vld [vmem:[%s2307_s3 + $0x890] sm:$0xff]  ;;  %v1023_v4 = vadd.f32 %v2324_v11, %v496_v1  ;;  %v1024_v5 = vadd.f32 %v2319_v8, %v497_v2  ;;  %v499_v7 = vld [vmem:[%s2307_s3 + $0x898] sm:$0xff] }
  0xf3   : > { %1509 = vst [vmem:[%s2347_s20 + $0x7c0] sm:$0xff] %v999_v20  ;;  %1510 = vst [vmem:[%s2347_s20 + $0x7c8] sm:$0xff] %v1000_v21  ;;  %v1025_v6 = vadd.f32 %v2321_v9, %v498_v3  ;;  %v500_v10 = vld [vmem:[%s2307_s3 + $0x8a0] sm:$0xff]  ;;  %v501_v12 = vld [vmem:[%s2307_s3 + $0x8a8] sm:$0xff]  ;;  %v1026_v13 = vadd.f32 %v2324_v11, %v499_v7 }
  0xf4   : > { %1511 = vst [vmem:[%s2347_s20 + $0x7d0] sm:$0xff] %v1001_v22  ;;  %1512 = vst [vmem:[%s2347_s20 + $0x7d8] sm:$0xff] %v1002_v26  ;;  %v1027_v14 = vadd.f32 %v2319_v8, %v500_v10  ;;  %v1028_v15 = vadd.f32 %v2321_v9, %v501_v12  ;;  %v502_v16 = vld [vmem:[%s2307_s3 + $0x8b0] sm:$0xff]  ;;  %v503_v17 = vld [vmem:[%s2307_s3 + $0x8b8] sm:$0xff] }
  0xf5   : > { %1513 = vst [vmem:[%s2347_s20 + $0x7e0] sm:$0xff] %v1003_v27  ;;  %1514 = vst [vmem:[%s2347_s20 + $0x7e8] sm:$0xff] %v1004_v28  ;;  %v504_v18 = vld [vmem:[%s2307_s3 + $0x8c0] sm:$0xff]  ;;  %v1029_v19 = vadd.f32 %v2324_v11, %v502_v16  ;;  %v1030_v20 = vadd.f32 %v2319_v8, %v503_v17  ;;  %v505_v22 = vld [vmem:[%s2307_s3 + $0x8c8] sm:$0xff] }
  0xf6   : > { %1515 = vst [vmem:[%s2347_s20 + $0x7f0] sm:$0xff] %v1005_v32  ;;  %1516 = vst [vmem:[%s2347_s20 + $0x7f8] sm:$0xff] %v1006_v33  ;;  %v1031_v21 = vadd.f32 %v2321_v9, %v504_v18  ;;  %v506_v23 = vld [vmem:[%s2307_s3 + $0x8d0] sm:$0xff]  ;;  %v507_v24 = vld [vmem:[%s2307_s3 + $0x8d8] sm:$0xff]  ;;  %v1032_v25 = vadd.f32 %v2324_v11, %v505_v22 }
  0xf7   : > { %1517 = vst [vmem:[%s2347_s20 + $0x800] sm:$0xff] %v1007_v34  ;;  %1518 = vst [vmem:[%s2347_s20 + $0x808] sm:$0xff] %v1008_v38  ;;  %v1033_v26 = vadd.f32 %v2319_v8, %v506_v23  ;;  %v1034_v27 = vadd.f32 %v2321_v9, %v507_v24  ;;  %v508_v28 = vld [vmem:[%s2307_s3 + $0x8e0] sm:$0xff]  ;;  %v509_v29 = vld [vmem:[%s2307_s3 + $0x8e8] sm:$0xff] }
  0xf8   : > { %1519 = vst [vmem:[%s2347_s20 + $0x810] sm:$0xff] %v1009_v39  ;;  %1520 = vst [vmem:[%s2347_s20 + $0x818] sm:$0xff] %v1010_v40  ;;  %v510_v30 = vld [vmem:[%s2307_s3 + $0x8f0] sm:$0xff]  ;;  %v1035_v31 = vadd.f32 %v2324_v11, %v508_v28  ;;  %v1036_v32 = vadd.f32 %v2319_v8, %v509_v29  ;;  %v511_v34 = vld [vmem:[%s2307_s3 + $0x8f8] sm:$0xff] }
  0xf9   : > { %1521 = vst [vmem:[%s2347_s20 + $0x820] sm:$0xff] %v1011_v44  ;;  %1522 = vst [vmem:[%s2347_s20 + $0x828] sm:$0xff] %v1012_v45  ;;  %v1037_v33 = vadd.f32 %v2321_v9, %v510_v30  ;;  %v512_v35 = vld [vmem:[%s2307_s3 + $0x900] sm:$0xff]  ;;  %v513_v36 = vld [vmem:[%s2307_s3 + $0x908] sm:$0xff]  ;;  %v1038_v37 = vadd.f32 %v2324_v11, %v511_v34 }
  0xfa   : > { %1523 = vst [vmem:[%s2347_s20 + $0x830] sm:$0xff] %v1013_v46  ;;  %1524 = vst [vmem:[%s2347_s20 + $0x838] sm:$0xff] %v1014_v50  ;;  %v1039_v38 = vadd.f32 %v2319_v8, %v512_v35  ;;  %v1040_v39 = vadd.f32 %v2321_v9, %v513_v36  ;;  %v514_v40 = vld [vmem:[%s2307_s3 + $0x910] sm:$0xff]  ;;  %v515_v41 = vld [vmem:[%s2307_s3 + $0x918] sm:$0xff] }
  0xfb   : > { %1525 = vst [vmem:[%s2347_s20 + $0x840] sm:$0xff] %v1015_v51  ;;  %1526 = vst [vmem:[%s2347_s20 + $0x848] sm:$0xff] %v1016_v52  ;;  %v516_v42 = vld [vmem:[%s2307_s3 + $0x920] sm:$0xff]  ;;  %v1041_v43 = vadd.f32 %v2324_v11, %v514_v40  ;;  %v1042_v44 = vadd.f32 %v2319_v8, %v515_v41  ;;  %v517_v46 = vld [vmem:[%s2307_s3 + $0x928] sm:$0xff] }
  0xfc   : > { %1527 = vst [vmem:[%s2347_s20 + $0x850] sm:$0xff] %v1017_v56  ;;  %1528 = vst [vmem:[%s2347_s20 + $0x858] sm:$0xff] %v1018_v57  ;;  %v1043_v45 = vadd.f32 %v2321_v9, %v516_v42  ;;  %v518_v47 = vld [vmem:[%s2307_s3 + $0x930] sm:$0xff]  ;;  %v519_v48 = vld [vmem:[%s2307_s3 + $0x938] sm:$0xff]  ;;  %v1044_v49 = vadd.f32 %v2324_v11, %v517_v46 }
  0xfd   : > { %1529 = vst [vmem:[%s2347_s20 + $0x860] sm:$0xff] %v1019_v58  ;;  %1530 = vst [vmem:[%s2347_s20 + $0x868] sm:$0xff] %v1020_v62  ;;  %v1045_v50 = vadd.f32 %v2319_v8, %v518_v47  ;;  %v1046_v51 = vadd.f32 %v2321_v9, %v519_v48  ;;  %v520_v52 = vld [vmem:[%s2307_s3 + $0x940] sm:$0xff]  ;;  %v521_v53 = vld [vmem:[%s2307_s3 + $0x948] sm:$0xff] }
  0xfe   : > { %1531 = vst [vmem:[%s2347_s20 + $0x870] sm:$0xff] %v1021_v63  ;;  %1532 = vst [vmem:[%s2347_s20 + $0x878] sm:$0xff] %v1022_v0  ;;  %v522_v54 = vld [vmem:[%s2307_s3 + $0x950] sm:$0xff]  ;;  %v1047_v55 = vadd.f32 %v2324_v11, %v520_v52  ;;  %v1048_v56 = vadd.f32 %v2319_v8, %v521_v53  ;;  %v523_v58 = vld [vmem:[%s2307_s3 + $0x958] sm:$0xff] }
  0xff   : > { %1533 = vst [vmem:[%s2347_s20 + $0x880] sm:$0xff] %v1023_v4  ;;  %1534 = vst [vmem:[%s2347_s20 + $0x888] sm:$0xff] %v1024_v5  ;;  %v1049_v57 = vadd.f32 %v2321_v9, %v522_v54  ;;  %v524_v59 = vld [vmem:[%s2307_s3 + $0x960] sm:$0xff]  ;;  %v525_v60 = vld [vmem:[%s2307_s3 + $0x968] sm:$0xff]  ;;  %v1050_v61 = vadd.f32 %v2324_v11, %v523_v58 }
 0x100   : > { %1535 = vst [vmem:[%s2347_s20 + $0x890] sm:$0xff] %v1025_v6  ;;  %1536 = vst [vmem:[%s2347_s20 + $0x898] sm:$0xff] %v1026_v13  ;;  %v1051_v62 = vadd.f32 %v2319_v8, %v524_v59  ;;  %v1052_v63 = vadd.f32 %v2321_v9, %v525_v60  ;;  %v526_v0 = vld [vmem:[%s2307_s3 + $0x970] sm:$0xff]  ;;  %v527_v1 = vld [vmem:[%s2307_s3 + $0x978] sm:$0xff] }
 0x101   : > { %1537 = vst [vmem:[%s2347_s20 + $0x8a0] sm:$0xff] %v1027_v14  ;;  %1538 = vst [vmem:[%s2347_s20 + $0x8a8] sm:$0xff] %v1028_v15  ;;  %v528_v2 = vld [vmem:[%s2307_s3 + $0x980] sm:$0xff]  ;;  %v1053_v3 = vadd.f32 %v2324_v11, %v526_v0  ;;  %v1054_v4 = vadd.f32 %v2319_v8, %v527_v1  ;;  %v529_v6 = vld [vmem:[%s2307_s3 + $0x988] sm:$0xff] }
 0x102   : > { %1539 = vst [vmem:[%s2347_s20 + $0x8b0] sm:$0xff] %v1029_v19  ;;  %1540 = vst [vmem:[%s2347_s20 + $0x8b8] sm:$0xff] %v1030_v20  ;;  %v1055_v5 = vadd.f32 %v2321_v9, %v528_v2  ;;  %v530_v7 = vld [vmem:[%s2307_s3 + $0x990] sm:$0xff]  ;;  %v531_v10 = vld [vmem:[%s2307_s3 + $0x998] sm:$0xff]  ;;  %v1056_v12 = vadd.f32 %v2324_v11, %v529_v6 }
 0x103   : > { %1541 = vst [vmem:[%s2347_s20 + $0x8c0] sm:$0xff] %v1031_v21  ;;  %1542 = vst [vmem:[%s2347_s20 + $0x8c8] sm:$0xff] %v1032_v25  ;;  %v1057_v13 = vadd.f32 %v2319_v8, %v530_v7  ;;  %v1058_v14 = vadd.f32 %v2321_v9, %v531_v10  ;;  %v532_v15 = vld [vmem:[%s2307_s3 + $0x9a0] sm:$0xff]  ;;  %v533_v16 = vld [vmem:[%s2307_s3 + $0x9a8] sm:$0xff] }
 0x104   : > { %1543 = vst [vmem:[%s2347_s20 + $0x8d0] sm:$0xff] %v1033_v26  ;;  %1544 = vst [vmem:[%s2347_s20 + $0x8d8] sm:$0xff] %v1034_v27  ;;  %v534_v17 = vld [vmem:[%s2307_s3 + $0x9b0] sm:$0xff]  ;;  %v1059_v18 = vadd.f32 %v2324_v11, %v532_v15  ;;  %v1060_v19 = vadd.f32 %v2319_v8, %v533_v16  ;;  %v535_v21 = vld [vmem:[%s2307_s3 + $0x9b8] sm:$0xff] }
 0x105   : > { %1545 = vst [vmem:[%s2347_s20 + $0x8e0] sm:$0xff] %v1035_v31  ;;  %1546 = vst [vmem:[%s2347_s20 + $0x8e8] sm:$0xff] %v1036_v32  ;;  %v1061_v20 = vadd.f32 %v2321_v9, %v534_v17  ;;  %v536_v22 = vld [vmem:[%s2307_s3 + $0x9c0] sm:$0xff]  ;;  %v537_v23 = vld [vmem:[%s2307_s3 + $0x9c8] sm:$0xff]  ;;  %v1062_v24 = vadd.f32 %v2324_v11, %v535_v21 }
 0x106   : > { %1547 = vst [vmem:[%s2347_s20 + $0x8f0] sm:$0xff] %v1037_v33  ;;  %1548 = vst [vmem:[%s2347_s20 + $0x8f8] sm:$0xff] %v1038_v37  ;;  %v1063_v25 = vadd.f32 %v2319_v8, %v536_v22  ;;  %v1064_v26 = vadd.f32 %v2321_v9, %v537_v23  ;;  %v538_v27 = vld [vmem:[%s2307_s3 + $0x9d0] sm:$0xff]  ;;  %v539_v28 = vld [vmem:[%s2307_s3 + $0x9d8] sm:$0xff] }
 0x107   : > { %1549 = vst [vmem:[%s2347_s20 + $0x900] sm:$0xff] %v1039_v38  ;;  %1550 = vst [vmem:[%s2347_s20 + $0x908] sm:$0xff] %v1040_v39  ;;  %v540_v29 = vld [vmem:[%s2307_s3 + $0x9e0] sm:$0xff]  ;;  %v1065_v30 = vadd.f32 %v2324_v11, %v538_v27  ;;  %v1066_v31 = vadd.f32 %v2319_v8, %v539_v28  ;;  %v541_v33 = vld [vmem:[%s2307_s3 + $0x9e8] sm:$0xff] }
 0x108   : > { %1551 = vst [vmem:[%s2347_s20 + $0x910] sm:$0xff] %v1041_v43  ;;  %1552 = vst [vmem:[%s2347_s20 + $0x918] sm:$0xff] %v1042_v44  ;;  %v1067_v32 = vadd.f32 %v2321_v9, %v540_v29  ;;  %v542_v34 = vld [vmem:[%s2307_s3 + $0x9f0] sm:$0xff]  ;;  %v543_v35 = vld [vmem:[%s2307_s3 + $0x9f8] sm:$0xff]  ;;  %v1068_v36 = vadd.f32 %v2324_v11, %v541_v33 }
 0x109   : > { %1553 = vst [vmem:[%s2347_s20 + $0x920] sm:$0xff] %v1043_v45  ;;  %1554 = vst [vmem:[%s2347_s20 + $0x928] sm:$0xff] %v1044_v49  ;;  %v1069_v37 = vadd.f32 %v2319_v8, %v542_v34  ;;  %v1070_v38 = vadd.f32 %v2321_v9, %v543_v35  ;;  %v544_v39 = vld [vmem:[%s2307_s3 + $0xa00] sm:$0xff]  ;;  %v545_v40 = vld [vmem:[%s2307_s3 + $0xa08] sm:$0xff] }
 0x10a   : > { %1555 = vst [vmem:[%s2347_s20 + $0x930] sm:$0xff] %v1045_v50  ;;  %1556 = vst [vmem:[%s2347_s20 + $0x938] sm:$0xff] %v1046_v51  ;;  %v546_v41 = vld [vmem:[%s2307_s3 + $0xa10] sm:$0xff]  ;;  %v1071_v42 = vadd.f32 %v2324_v11, %v544_v39  ;;  %v1072_v43 = vadd.f32 %v2319_v8, %v545_v40  ;;  %v547_v45 = vld [vmem:[%s2307_s3 + $0xa18] sm:$0xff] }
 0x10b   : > { %1557 = vst [vmem:[%s2347_s20 + $0x940] sm:$0xff] %v1047_v55  ;;  %1558 = vst [vmem:[%s2347_s20 + $0x948] sm:$0xff] %v1048_v56  ;;  %v1073_v44 = vadd.f32 %v2321_v9, %v546_v41  ;;  %v548_v46 = vld [vmem:[%s2307_s3 + $0xa20] sm:$0xff]  ;;  %v549_v47 = vld [vmem:[%s2307_s3 + $0xa28] sm:$0xff]  ;;  %v1074_v48 = vadd.f32 %v2324_v11, %v547_v45 }
 0x10c   : > { %1559 = vst [vmem:[%s2347_s20 + $0x950] sm:$0xff] %v1049_v57  ;;  %1560 = vst [vmem:[%s2347_s20 + $0x958] sm:$0xff] %v1050_v61  ;;  %v1075_v49 = vadd.f32 %v2319_v8, %v548_v46  ;;  %v1076_v50 = vadd.f32 %v2321_v9, %v549_v47  ;;  %v550_v51 = vld [vmem:[%s2307_s3 + $0xa30] sm:$0xff]  ;;  %v551_v52 = vld [vmem:[%s2307_s3 + $0xa38] sm:$0xff] }
 0x10d   : > { %1561 = vst [vmem:[%s2347_s20 + $0x960] sm:$0xff] %v1051_v62  ;;  %1562 = vst [vmem:[%s2347_s20 + $0x968] sm:$0xff] %v1052_v63  ;;  %v552_v53 = vld [vmem:[%s2307_s3 + $0xa40] sm:$0xff]  ;;  %v1077_v54 = vadd.f32 %v2324_v11, %v550_v51  ;;  %v1078_v55 = vadd.f32 %v2319_v8, %v551_v52  ;;  %v553_v57 = vld [vmem:[%s2307_s3 + $0xa48] sm:$0xff] }
 0x10e   : > { %1563 = vst [vmem:[%s2347_s20 + $0x970] sm:$0xff] %v1053_v3  ;;  %1564 = vst [vmem:[%s2347_s20 + $0x978] sm:$0xff] %v1054_v4  ;;  %v1079_v56 = vadd.f32 %v2321_v9, %v552_v53  ;;  %v554_v58 = vld [vmem:[%s2307_s3 + $0xa50] sm:$0xff]  ;;  %v555_v59 = vld [vmem:[%s2307_s3 + $0xa58] sm:$0xff]  ;;  %v1080_v60 = vadd.f32 %v2324_v11, %v553_v57 }
 0x10f   : > { %1565 = vst [vmem:[%s2347_s20 + $0x980] sm:$0xff] %v1055_v5  ;;  %1566 = vst [vmem:[%s2347_s20 + $0x988] sm:$0xff] %v1056_v12  ;;  %v1081_v61 = vadd.f32 %v2319_v8, %v554_v58  ;;  %v1082_v62 = vadd.f32 %v2321_v9, %v555_v59  ;;  %v556_v63 = vld [vmem:[%s2307_s3 + $0xa60] sm:$0xff]  ;;  %v557_v0 = vld [vmem:[%s2307_s3 + $0xa68] sm:$0xff] }
 0x110   : > { %1567 = vst [vmem:[%s2347_s20 + $0x990] sm:$0xff] %v1057_v13  ;;  %1568 = vst [vmem:[%s2347_s20 + $0x998] sm:$0xff] %v1058_v14  ;;  %v558_v1 = vld [vmem:[%s2307_s3 + $0xa70] sm:$0xff]  ;;  %v1083_v2 = vadd.f32 %v2324_v11, %v556_v63  ;;  %v1084_v3 = vadd.f32 %v2319_v8, %v557_v0  ;;  %v559_v5 = vld [vmem:[%s2307_s3 + $0xa78] sm:$0xff] }
 0x111   : > { %1569 = vst [vmem:[%s2347_s20 + $0x9a0] sm:$0xff] %v1059_v18  ;;  %1570 = vst [vmem:[%s2347_s20 + $0x9a8] sm:$0xff] %v1060_v19  ;;  %v1085_v4 = vadd.f32 %v2321_v9, %v558_v1  ;;  %v560_v6 = vld [vmem:[%s2307_s3 + $0xa80] sm:$0xff]  ;;  %v561_v7 = vld [vmem:[%s2307_s3 + $0xa88] sm:$0xff]  ;;  %v1086_v10 = vadd.f32 %v2324_v11, %v559_v5 }
 0x112   : > { %1571 = vst [vmem:[%s2347_s20 + $0x9b0] sm:$0xff] %v1061_v20  ;;  %1572 = vst [vmem:[%s2347_s20 + $0x9b8] sm:$0xff] %v1062_v24  ;;  %v1087_v12 = vadd.f32 %v2319_v8, %v560_v6  ;;  %v1088_v13 = vadd.f32 %v2321_v9, %v561_v7  ;;  %v562_v14 = vld [vmem:[%s2307_s3 + $0xa90] sm:$0xff]  ;;  %v563_v15 = vld [vmem:[%s2307_s3 + $0xa98] sm:$0xff] }
 0x113   : > { %1573 = vst [vmem:[%s2347_s20 + $0x9c0] sm:$0xff] %v1063_v25  ;;  %1574 = vst [vmem:[%s2347_s20 + $0x9c8] sm:$0xff] %v1064_v26  ;;  %v564_v16 = vld [vmem:[%s2307_s3 + $0xaa0] sm:$0xff]  ;;  %v1089_v17 = vadd.f32 %v2324_v11, %v562_v14  ;;  %v1090_v18 = vadd.f32 %v2319_v8, %v563_v15  ;;  %v565_v20 = vld [vmem:[%s2307_s3 + $0xaa8] sm:$0xff] }
 0x114   : > { %1575 = vst [vmem:[%s2347_s20 + $0x9d0] sm:$0xff] %v1065_v30  ;;  %1576 = vst [vmem:[%s2347_s20 + $0x9d8] sm:$0xff] %v1066_v31  ;;  %v1091_v19 = vadd.f32 %v2321_v9, %v564_v16  ;;  %v566_v21 = vld [vmem:[%s2307_s3 + $0xab0] sm:$0xff]  ;;  %v567_v22 = vld [vmem:[%s2307_s3 + $0xab8] sm:$0xff]  ;;  %v1092_v23 = vadd.f32 %v2324_v11, %v565_v20 }
 0x115   : > { %1577 = vst [vmem:[%s2347_s20 + $0x9e0] sm:$0xff] %v1067_v32  ;;  %1578 = vst [vmem:[%s2347_s20 + $0x9e8] sm:$0xff] %v1068_v36  ;;  %v1093_v24 = vadd.f32 %v2319_v8, %v566_v21  ;;  %v1094_v25 = vadd.f32 %v2321_v9, %v567_v22  ;;  %v568_v26 = vld [vmem:[%s2307_s3 + $0xac0] sm:$0xff]  ;;  %v569_v27 = vld [vmem:[%s2307_s3 + $0xac8] sm:$0xff] }
 0x116   : > { %1579 = vst [vmem:[%s2347_s20 + $0x9f0] sm:$0xff] %v1069_v37  ;;  %1580 = vst [vmem:[%s2347_s20 + $0x9f8] sm:$0xff] %v1070_v38  ;;  %v570_v28 = vld [vmem:[%s2307_s3 + $0xad0] sm:$0xff]  ;;  %v1095_v29 = vadd.f32 %v2324_v11, %v568_v26  ;;  %v1096_v30 = vadd.f32 %v2319_v8, %v569_v27  ;;  %v571_v32 = vld [vmem:[%s2307_s3 + $0xad8] sm:$0xff] }
 0x117   : > { %1581 = vst [vmem:[%s2347_s20 + $0xa00] sm:$0xff] %v1071_v42  ;;  %1582 = vst [vmem:[%s2347_s20 + $0xa08] sm:$0xff] %v1072_v43  ;;  %v1097_v31 = vadd.f32 %v2321_v9, %v570_v28  ;;  %v572_v33 = vld [vmem:[%s2307_s3 + $0xae0] sm:$0xff]  ;;  %v573_v34 = vld [vmem:[%s2307_s3 + $0xae8] sm:$0xff]  ;;  %v1098_v35 = vadd.f32 %v2324_v11, %v571_v32 }
 0x118   : > { %1583 = vst [vmem:[%s2347_s20 + $0xa10] sm:$0xff] %v1073_v44  ;;  %1584 = vst [vmem:[%s2347_s20 + $0xa18] sm:$0xff] %v1074_v48  ;;  %v1099_v36 = vadd.f32 %v2319_v8, %v572_v33  ;;  %v1100_v37 = vadd.f32 %v2321_v9, %v573_v34  ;;  %v574_v38 = vld [vmem:[%s2307_s3 + $0xaf0] sm:$0xff]  ;;  %v575_v39 = vld [vmem:[%s2307_s3 + $0xaf8] sm:$0xff] }
 0x119   : > { %1585 = vst [vmem:[%s2347_s20 + $0xa20] sm:$0xff] %v1075_v49  ;;  %1586 = vst [vmem:[%s2347_s20 + $0xa28] sm:$0xff] %v1076_v50  ;;  %v576_v40 = vld [vmem:[%s2307_s3 + $0xb00] sm:$0xff]  ;;  %v1101_v41 = vadd.f32 %v2324_v11, %v574_v38  ;;  %v1102_v42 = vadd.f32 %v2319_v8, %v575_v39  ;;  %v577_v44 = vld [vmem:[%s2307_s3 + $0xb08] sm:$0xff] }
 0x11a   : > { %1587 = vst [vmem:[%s2347_s20 + $0xa30] sm:$0xff] %v1077_v54  ;;  %1588 = vst [vmem:[%s2347_s20 + $0xa38] sm:$0xff] %v1078_v55  ;;  %v1103_v43 = vadd.f32 %v2321_v9, %v576_v40  ;;  %v578_v45 = vld [vmem:[%s2307_s3 + $0xb10] sm:$0xff]  ;;  %v579_v46 = vld [vmem:[%s2307_s3 + $0xb18] sm:$0xff]  ;;  %v1104_v47 = vadd.f32 %v2324_v11, %v577_v44 }
 0x11b   : > { %1589 = vst [vmem:[%s2347_s20 + $0xa40] sm:$0xff] %v1079_v56  ;;  %1590 = vst [vmem:[%s2347_s20 + $0xa48] sm:$0xff] %v1080_v60  ;;  %v1105_v48 = vadd.f32 %v2319_v8, %v578_v45  ;;  %v1106_v49 = vadd.f32 %v2321_v9, %v579_v46  ;;  %v580_v50 = vld [vmem:[%s2307_s3 + $0xb20] sm:$0xff]  ;;  %v581_v51 = vld [vmem:[%s2307_s3 + $0xb28] sm:$0xff] }
 0x11c   : > { %1591 = vst [vmem:[%s2347_s20 + $0xa50] sm:$0xff] %v1081_v61  ;;  %1592 = vst [vmem:[%s2347_s20 + $0xa58] sm:$0xff] %v1082_v62  ;;  %v582_v52 = vld [vmem:[%s2307_s3 + $0xb30] sm:$0xff]  ;;  %v1107_v53 = vadd.f32 %v2324_v11, %v580_v50  ;;  %v1108_v54 = vadd.f32 %v2319_v8, %v581_v51  ;;  %v583_v56 = vld [vmem:[%s2307_s3 + $0xb38] sm:$0xff] }
 0x11d   : > { %1593 = vst [vmem:[%s2347_s20 + $0xa60] sm:$0xff] %v1083_v2  ;;  %1594 = vst [vmem:[%s2347_s20 + $0xa68] sm:$0xff] %v1084_v3  ;;  %v1109_v55 = vadd.f32 %v2321_v9, %v582_v52  ;;  %v584_v57 = vld [vmem:[%s2307_s3 + $0xb40] sm:$0xff]  ;;  %v585_v58 = vld [vmem:[%s2307_s3 + $0xb48] sm:$0xff]  ;;  %v1110_v59 = vadd.f32 %v2324_v11, %v583_v56 }
 0x11e   : > { %1595 = vst [vmem:[%s2347_s20 + $0xa70] sm:$0xff] %v1085_v4  ;;  %1596 = vst [vmem:[%s2347_s20 + $0xa78] sm:$0xff] %v1086_v10  ;;  %v1111_v60 = vadd.f32 %v2319_v8, %v584_v57  ;;  %v1112_v61 = vadd.f32 %v2321_v9, %v585_v58  ;;  %v586_v62 = vld [vmem:[%s2307_s3 + $0xb50] sm:$0xff]  ;;  %v587_v63 = vld [vmem:[%s2307_s3 + $0xb58] sm:$0xff] }
 0x11f   : > { %1597 = vst [vmem:[%s2347_s20 + $0xa80] sm:$0xff] %v1087_v12  ;;  %1598 = vst [vmem:[%s2347_s20 + $0xa88] sm:$0xff] %v1088_v13  ;;  %v588_v0 = vld [vmem:[%s2307_s3 + $0xb60] sm:$0xff]  ;;  %v1113_v1 = vadd.f32 %v2324_v11, %v586_v62  ;;  %v1114_v2 = vadd.f32 %v2319_v8, %v587_v63  ;;  %v589_v4 = vld [vmem:[%s2307_s3 + $0xb68] sm:$0xff] }
 0x120   : > { %1599 = vst [vmem:[%s2347_s20 + $0xa90] sm:$0xff] %v1089_v17  ;;  %1600 = vst [vmem:[%s2347_s20 + $0xa98] sm:$0xff] %v1090_v18  ;;  %v1115_v3 = vadd.f32 %v2321_v9, %v588_v0  ;;  %v590_v5 = vld [vmem:[%s2307_s3 + $0xb70] sm:$0xff]  ;;  %v591_v6 = vld [vmem:[%s2307_s3 + $0xb78] sm:$0xff]  ;;  %v1116_v7 = vadd.f32 %v2324_v11, %v589_v4 }
 0x121   : > { %1601 = vst [vmem:[%s2347_s20 + $0xaa0] sm:$0xff] %v1091_v19  ;;  %1602 = vst [vmem:[%s2347_s20 + $0xaa8] sm:$0xff] %v1092_v23  ;;  %v1117_v10 = vadd.f32 %v2319_v8, %v590_v5  ;;  %v1118_v12 = vadd.f32 %v2321_v9, %v591_v6  ;;  %v592_v13 = vld [vmem:[%s2307_s3 + $0xb80] sm:$0xff]  ;;  %v593_v14 = vld [vmem:[%s2307_s3 + $0xb88] sm:$0xff] }
 0x122   : > { %1603 = vst [vmem:[%s2347_s20 + $0xab0] sm:$0xff] %v1093_v24  ;;  %1604 = vst [vmem:[%s2347_s20 + $0xab8] sm:$0xff] %v1094_v25  ;;  %v594_v15 = vld [vmem:[%s2307_s3 + $0xb90] sm:$0xff]  ;;  %v1119_v16 = vadd.f32 %v2324_v11, %v592_v13  ;;  %v1120_v17 = vadd.f32 %v2319_v8, %v593_v14  ;;  %v595_v19 = vld [vmem:[%s2307_s3 + $0xb98] sm:$0xff] }
 0x123   : > { %1605 = vst [vmem:[%s2347_s20 + $0xac0] sm:$0xff] %v1095_v29  ;;  %1606 = vst [vmem:[%s2347_s20 + $0xac8] sm:$0xff] %v1096_v30  ;;  %v1121_v18 = vadd.f32 %v2321_v9, %v594_v15  ;;  %v596_v20 = vld [vmem:[%s2307_s3 + $0xba0] sm:$0xff]  ;;  %v597_v21 = vld [vmem:[%s2307_s3 + $0xba8] sm:$0xff]  ;;  %v1122_v22 = vadd.f32 %v2324_v11, %v595_v19 }
 0x124   : > { %1607 = vst [vmem:[%s2347_s20 + $0xad0] sm:$0xff] %v1097_v31  ;;  %1608 = vst [vmem:[%s2347_s20 + $0xad8] sm:$0xff] %v1098_v35  ;;  %v1123_v23 = vadd.f32 %v2319_v8, %v596_v20  ;;  %v1124_v24 = vadd.f32 %v2321_v9, %v597_v21  ;;  %v598_v25 = vld [vmem:[%s2307_s3 + $0xbb0] sm:$0xff]  ;;  %v599_v26 = vld [vmem:[%s2307_s3 + $0xbb8] sm:$0xff] }
 0x125   : > { %1609 = vst [vmem:[%s2347_s20 + $0xae0] sm:$0xff] %v1099_v36  ;;  %1610 = vst [vmem:[%s2347_s20 + $0xae8] sm:$0xff] %v1100_v37  ;;  %v600_v27 = vld [vmem:[%s2307_s3 + $0xbc0] sm:$0xff]  ;;  %v1125_v28 = vadd.f32 %v2324_v11, %v598_v25  ;;  %v1126_v29 = vadd.f32 %v2319_v8, %v599_v26  ;;  %v601_v31 = vld [vmem:[%s2307_s3 + $0xbc8] sm:$0xff] }
 0x126   : > { %1611 = vst [vmem:[%s2347_s20 + $0xaf0] sm:$0xff] %v1101_v41  ;;  %1612 = vst [vmem:[%s2347_s20 + $0xaf8] sm:$0xff] %v1102_v42  ;;  %v1127_v30 = vadd.f32 %v2321_v9, %v600_v27  ;;  %v602_v32 = vld [vmem:[%s2307_s3 + $0xbd0] sm:$0xff]  ;;  %v603_v33 = vld [vmem:[%s2307_s3 + $0xbd8] sm:$0xff]  ;;  %v1128_v34 = vadd.f32 %v2324_v11, %v601_v31 }
 0x127   : > { %1613 = vst [vmem:[%s2347_s20 + $0xb00] sm:$0xff] %v1103_v43  ;;  %1614 = vst [vmem:[%s2347_s20 + $0xb08] sm:$0xff] %v1104_v47  ;;  %v1129_v35 = vadd.f32 %v2319_v8, %v602_v32  ;;  %v1130_v36 = vadd.f32 %v2321_v9, %v603_v33  ;;  %v604_v37 = vld [vmem:[%s2307_s3 + $0xbe0] sm:$0xff]  ;;  %v605_v38 = vld [vmem:[%s2307_s3 + $0xbe8] sm:$0xff] }
 0x128   : > { %1615 = vst [vmem:[%s2347_s20 + $0xb10] sm:$0xff] %v1105_v48  ;;  %1616 = vst [vmem:[%s2347_s20 + $0xb18] sm:$0xff] %v1106_v49  ;;  %v606_v39 = vld [vmem:[%s2307_s3 + $0xbf0] sm:$0xff]  ;;  %v1131_v40 = vadd.f32 %v2324_v11, %v604_v37  ;;  %v1132_v41 = vadd.f32 %v2319_v8, %v605_v38  ;;  %v607_v43 = vld [vmem:[%s2307_s3 + $0xbf8] sm:$0xff] }
 0x129   : > { %1617 = vst [vmem:[%s2347_s20 + $0xb20] sm:$0xff] %v1107_v53  ;;  %1618 = vst [vmem:[%s2347_s20 + $0xb28] sm:$0xff] %v1108_v54  ;;  %v1133_v42 = vadd.f32 %v2321_v9, %v606_v39  ;;  %v608_v44 = vld [vmem:[%s2307_s3 + $0xc00] sm:$0xff]  ;;  %v609_v45 = vld [vmem:[%s2307_s3 + $0xc08] sm:$0xff]  ;;  %v1134_v46 = vadd.f32 %v2324_v11, %v607_v43 }
 0x12a   : > { %1619 = vst [vmem:[%s2347_s20 + $0xb30] sm:$0xff] %v1109_v55  ;;  %1620 = vst [vmem:[%s2347_s20 + $0xb38] sm:$0xff] %v1110_v59  ;;  %v1135_v47 = vadd.f32 %v2319_v8, %v608_v44  ;;  %v1136_v48 = vadd.f32 %v2321_v9, %v609_v45  ;;  %v610_v49 = vld [vmem:[%s2307_s3 + $0xc10] sm:$0xff]  ;;  %v611_v50 = vld [vmem:[%s2307_s3 + $0xc18] sm:$0xff] }
 0x12b   : > { %1621 = vst [vmem:[%s2347_s20 + $0xb40] sm:$0xff] %v1111_v60  ;;  %1622 = vst [vmem:[%s2347_s20 + $0xb48] sm:$0xff] %v1112_v61  ;;  %v612_v51 = vld [vmem:[%s2307_s3 + $0xc20] sm:$0xff]  ;;  %v1137_v52 = vadd.f32 %v2324_v11, %v610_v49  ;;  %v1138_v53 = vadd.f32 %v2319_v8, %v611_v50  ;;  %v613_v55 = vld [vmem:[%s2307_s3 + $0xc28] sm:$0xff] }
 0x12c   : > { %1623 = vst [vmem:[%s2347_s20 + $0xb50] sm:$0xff] %v1113_v1  ;;  %1624 = vst [vmem:[%s2347_s20 + $0xb58] sm:$0xff] %v1114_v2  ;;  %v1139_v54 = vadd.f32 %v2321_v9, %v612_v51  ;;  %v614_v56 = vld [vmem:[%s2307_s3 + $0xc30] sm:$0xff]  ;;  %v615_v57 = vld [vmem:[%s2307_s3 + $0xc38] sm:$0xff]  ;;  %v1140_v58 = vadd.f32 %v2324_v11, %v613_v55 }
 0x12d   : > { %1625 = vst [vmem:[%s2347_s20 + $0xb60] sm:$0xff] %v1115_v3  ;;  %1626 = vst [vmem:[%s2347_s20 + $0xb68] sm:$0xff] %v1116_v7  ;;  %v1141_v59 = vadd.f32 %v2319_v8, %v614_v56  ;;  %v1142_v60 = vadd.f32 %v2321_v9, %v615_v57  ;;  %v616_v61 = vld [vmem:[%s2307_s3 + $0xc40] sm:$0xff]  ;;  %v617_v62 = vld [vmem:[%s2307_s3 + $0xc48] sm:$0xff] }
 0x12e   : > { %1627 = vst [vmem:[%s2347_s20 + $0xb70] sm:$0xff] %v1117_v10  ;;  %1628 = vst [vmem:[%s2347_s20 + $0xb78] sm:$0xff] %v1118_v12  ;;  %v618_v63 = vld [vmem:[%s2307_s3 + $0xc50] sm:$0xff]  ;;  %v1143_v0 = vadd.f32 %v2324_v11, %v616_v61  ;;  %v1144_v1 = vadd.f32 %v2319_v8, %v617_v62  ;;  %v619_v3 = vld [vmem:[%s2307_s3 + $0xc58] sm:$0xff] }
 0x12f   : > { %1629 = vst [vmem:[%s2347_s20 + $0xb80] sm:$0xff] %v1119_v16  ;;  %1630 = vst [vmem:[%s2347_s20 + $0xb88] sm:$0xff] %v1120_v17  ;;  %v1145_v2 = vadd.f32 %v2321_v9, %v618_v63  ;;  %v620_v4 = vld [vmem:[%s2307_s3 + $0xc60] sm:$0xff]  ;;  %v621_v5 = vld [vmem:[%s2307_s3 + $0xc68] sm:$0xff]  ;;  %v1146_v6 = vadd.f32 %v2324_v11, %v619_v3 }
 0x130   : > { %1631 = vst [vmem:[%s2347_s20 + $0xb90] sm:$0xff] %v1121_v18  ;;  %1632 = vst [vmem:[%s2347_s20 + $0xb98] sm:$0xff] %v1122_v22  ;;  %v1147_v7 = vadd.f32 %v2319_v8, %v620_v4  ;;  %v1148_v10 = vadd.f32 %v2321_v9, %v621_v5  ;;  %v622_v12 = vld [vmem:[%s2307_s3 + $0xc70] sm:$0xff]  ;;  %v623_v13 = vld [vmem:[%s2307_s3 + $0xc78] sm:$0xff] }
 0x131   : > { %1633 = vst [vmem:[%s2347_s20 + $0xba0] sm:$0xff] %v1123_v23  ;;  %1634 = vst [vmem:[%s2347_s20 + $0xba8] sm:$0xff] %v1124_v24  ;;  %v624_v14 = vld [vmem:[%s2307_s3 + $0xc80] sm:$0xff]  ;;  %v1149_v15 = vadd.f32 %v2324_v11, %v622_v12  ;;  %v1150_v16 = vadd.f32 %v2319_v8, %v623_v13  ;;  %v625_v18 = vld [vmem:[%s2307_s3 + $0xc88] sm:$0xff] }
 0x132   : > { %1635 = vst [vmem:[%s2347_s20 + $0xbb0] sm:$0xff] %v1125_v28  ;;  %1636 = vst [vmem:[%s2347_s20 + $0xbb8] sm:$0xff] %v1126_v29  ;;  %v1151_v17 = vadd.f32 %v2321_v9, %v624_v14  ;;  %v626_v19 = vld [vmem:[%s2307_s3 + $0xc90] sm:$0xff]  ;;  %v627_v20 = vld [vmem:[%s2307_s3 + $0xc98] sm:$0xff]  ;;  %v1152_v21 = vadd.f32 %v2324_v11, %v625_v18 }
 0x133   : > { %1637 = vst [vmem:[%s2347_s20 + $0xbc0] sm:$0xff] %v1127_v30  ;;  %1638 = vst [vmem:[%s2347_s20 + $0xbc8] sm:$0xff] %v1128_v34  ;;  %v1153_v22 = vadd.f32 %v2319_v8, %v626_v19  ;;  %v1154_v23 = vadd.f32 %v2321_v9, %v627_v20  ;;  %v628_v24 = vld [vmem:[%s2307_s3 + $0xca0] sm:$0xff]  ;;  %v629_v25 = vld [vmem:[%s2307_s3 + $0xca8] sm:$0xff] }
 0x134   : > { %1639 = vst [vmem:[%s2347_s20 + $0xbd0] sm:$0xff] %v1129_v35  ;;  %1640 = vst [vmem:[%s2347_s20 + $0xbd8] sm:$0xff] %v1130_v36  ;;  %v630_v26 = vld [vmem:[%s2307_s3 + $0xcb0] sm:$0xff]  ;;  %v1155_v27 = vadd.f32 %v2324_v11, %v628_v24  ;;  %v1156_v28 = vadd.f32 %v2319_v8, %v629_v25  ;;  %v631_v30 = vld [vmem:[%s2307_s3 + $0xcb8] sm:$0xff] }
 0x135   : > { %1641 = vst [vmem:[%s2347_s20 + $0xbe0] sm:$0xff] %v1131_v40  ;;  %1642 = vst [vmem:[%s2347_s20 + $0xbe8] sm:$0xff] %v1132_v41  ;;  %v1157_v29 = vadd.f32 %v2321_v9, %v630_v26  ;;  %v632_v31 = vld [vmem:[%s2307_s3 + $0xcc0] sm:$0xff]  ;;  %v633_v32 = vld [vmem:[%s2307_s3 + $0xcc8] sm:$0xff]  ;;  %v1158_v33 = vadd.f32 %v2324_v11, %v631_v30 }
 0x136   : > { %1643 = vst [vmem:[%s2347_s20 + $0xbf0] sm:$0xff] %v1133_v42  ;;  %1644 = vst [vmem:[%s2347_s20 + $0xbf8] sm:$0xff] %v1134_v46  ;;  %v1159_v34 = vadd.f32 %v2319_v8, %v632_v31  ;;  %v1160_v35 = vadd.f32 %v2321_v9, %v633_v32  ;;  %v634_v36 = vld [vmem:[%s2307_s3 + $0xcd0] sm:$0xff]  ;;  %v635_v37 = vld [vmem:[%s2307_s3 + $0xcd8] sm:$0xff] }
 0x137   : > { %1645 = vst [vmem:[%s2347_s20 + $0xc00] sm:$0xff] %v1135_v47  ;;  %1646 = vst [vmem:[%s2347_s20 + $0xc08] sm:$0xff] %v1136_v48  ;;  %v636_v38 = vld [vmem:[%s2307_s3 + $0xce0] sm:$0xff]  ;;  %v1161_v39 = vadd.f32 %v2324_v11, %v634_v36  ;;  %v1162_v40 = vadd.f32 %v2319_v8, %v635_v37  ;;  %v637_v42 = vld [vmem:[%s2307_s3 + $0xce8] sm:$0xff] }
 0x138   : > { %1647 = vst [vmem:[%s2347_s20 + $0xc10] sm:$0xff] %v1137_v52  ;;  %1648 = vst [vmem:[%s2347_s20 + $0xc18] sm:$0xff] %v1138_v53  ;;  %v1163_v41 = vadd.f32 %v2321_v9, %v636_v38  ;;  %v638_v43 = vld [vmem:[%s2307_s3 + $0xcf0] sm:$0xff]  ;;  %v639_v44 = vld [vmem:[%s2307_s3 + $0xcf8] sm:$0xff]  ;;  %v1164_v45 = vadd.f32 %v2324_v11, %v637_v42 }
 0x139   : > { %1649 = vst [vmem:[%s2347_s20 + $0xc20] sm:$0xff] %v1139_v54  ;;  %1650 = vst [vmem:[%s2347_s20 + $0xc28] sm:$0xff] %v1140_v58  ;;  %v1165_v46 = vadd.f32 %v2319_v8, %v638_v43  ;;  %v1166_v47 = vadd.f32 %v2321_v9, %v639_v44  ;;  %v640_v48 = vld [vmem:[%s2307_s3 + $0xd00] sm:$0xff]  ;;  %v641_v49 = vld [vmem:[%s2307_s3 + $0xd08] sm:$0xff] }
 0x13a   : > { %1651 = vst [vmem:[%s2347_s20 + $0xc30] sm:$0xff] %v1141_v59  ;;  %1652 = vst [vmem:[%s2347_s20 + $0xc38] sm:$0xff] %v1142_v60  ;;  %v642_v50 = vld [vmem:[%s2307_s3 + $0xd10] sm:$0xff]  ;;  %v1167_v51 = vadd.f32 %v2324_v11, %v640_v48  ;;  %v1168_v52 = vadd.f32 %v2319_v8, %v641_v49  ;;  %v643_v54 = vld [vmem:[%s2307_s3 + $0xd18] sm:$0xff] }
 0x13b   : > { %1653 = vst [vmem:[%s2347_s20 + $0xc40] sm:$0xff] %v1143_v0  ;;  %1654 = vst [vmem:[%s2347_s20 + $0xc48] sm:$0xff] %v1144_v1  ;;  %v1169_v53 = vadd.f32 %v2321_v9, %v642_v50  ;;  %v644_v55 = vld [vmem:[%s2307_s3 + $0xd20] sm:$0xff]  ;;  %v645_v56 = vld [vmem:[%s2307_s3 + $0xd28] sm:$0xff]  ;;  %v1170_v57 = vadd.f32 %v2324_v11, %v643_v54 }
 0x13c   : > { %1655 = vst [vmem:[%s2347_s20 + $0xc50] sm:$0xff] %v1145_v2  ;;  %1656 = vst [vmem:[%s2347_s20 + $0xc58] sm:$0xff] %v1146_v6  ;;  %v1171_v58 = vadd.f32 %v2319_v8, %v644_v55  ;;  %v1172_v59 = vadd.f32 %v2321_v9, %v645_v56  ;;  %v646_v60 = vld [vmem:[%s2307_s3 + $0xd30] sm:$0xff]  ;;  %v647_v61 = vld [vmem:[%s2307_s3 + $0xd38] sm:$0xff] }
 0x13d   : > { %1657 = vst [vmem:[%s2347_s20 + $0xc60] sm:$0xff] %v1147_v7  ;;  %1658 = vst [vmem:[%s2347_s20 + $0xc68] sm:$0xff] %v1148_v10  ;;  %v648_v62 = vld [vmem:[%s2307_s3 + $0xd40] sm:$0xff]  ;;  %v1173_v63 = vadd.f32 %v2324_v11, %v646_v60  ;;  %v1174_v0 = vadd.f32 %v2319_v8, %v647_v61  ;;  %v649_v2 = vld [vmem:[%s2307_s3 + $0xd48] sm:$0xff] }
 0x13e   : > { %1659 = vst [vmem:[%s2347_s20 + $0xc70] sm:$0xff] %v1149_v15  ;;  %1660 = vst [vmem:[%s2347_s20 + $0xc78] sm:$0xff] %v1150_v16  ;;  %v1175_v1 = vadd.f32 %v2321_v9, %v648_v62  ;;  %v650_v3 = vld [vmem:[%s2307_s3 + $0xd50] sm:$0xff]  ;;  %v651_v4 = vld [vmem:[%s2307_s3 + $0xd58] sm:$0xff]  ;;  %v1176_v5 = vadd.f32 %v2324_v11, %v649_v2 }
 0x13f   : > { %1661 = vst [vmem:[%s2347_s20 + $0xc80] sm:$0xff] %v1151_v17  ;;  %1662 = vst [vmem:[%s2347_s20 + $0xc88] sm:$0xff] %v1152_v21  ;;  %v1177_v6 = vadd.f32 %v2319_v8, %v650_v3  ;;  %v1178_v7 = vadd.f32 %v2321_v9, %v651_v4  ;;  %v652_v10 = vld [vmem:[%s2307_s3 + $0xd60] sm:$0xff]  ;;  %v653_v12 = vld [vmem:[%s2307_s3 + $0xd68] sm:$0xff] }
 0x140   : > { %1663 = vst [vmem:[%s2347_s20 + $0xc90] sm:$0xff] %v1153_v22  ;;  %1664 = vst [vmem:[%s2347_s20 + $0xc98] sm:$0xff] %v1154_v23  ;;  %v654_v13 = vld [vmem:[%s2307_s3 + $0xd70] sm:$0xff]  ;;  %v1179_v14 = vadd.f32 %v2324_v11, %v652_v10  ;;  %v1180_v15 = vadd.f32 %v2319_v8, %v653_v12  ;;  %v655_v17 = vld [vmem:[%s2307_s3 + $0xd78] sm:$0xff] }
 0x141   : > { %1665 = vst [vmem:[%s2347_s20 + $0xca0] sm:$0xff] %v1155_v27  ;;  %1666 = vst [vmem:[%s2347_s20 + $0xca8] sm:$0xff] %v1156_v28  ;;  %v1181_v16 = vadd.f32 %v2321_v9, %v654_v13  ;;  %v656_v18 = vld [vmem:[%s2307_s3 + $0xd80] sm:$0xff]  ;;  %v657_v19 = vld [vmem:[%s2307_s3 + $0xd88] sm:$0xff]  ;;  %v1182_v20 = vadd.f32 %v2324_v11, %v655_v17 }
 0x142   : > { %1667 = vst [vmem:[%s2347_s20 + $0xcb0] sm:$0xff] %v1157_v29  ;;  %1668 = vst [vmem:[%s2347_s20 + $0xcb8] sm:$0xff] %v1158_v33  ;;  %v1183_v21 = vadd.f32 %v2319_v8, %v656_v18  ;;  %v1184_v22 = vadd.f32 %v2321_v9, %v657_v19  ;;  %v658_v23 = vld [vmem:[%s2307_s3 + $0xd90] sm:$0xff]  ;;  %v659_v24 = vld [vmem:[%s2307_s3 + $0xd98] sm:$0xff] }
 0x143   : > { %1669 = vst [vmem:[%s2347_s20 + $0xcc0] sm:$0xff] %v1159_v34  ;;  %1670 = vst [vmem:[%s2347_s20 + $0xcc8] sm:$0xff] %v1160_v35  ;;  %v660_v25 = vld [vmem:[%s2307_s3 + $0xda0] sm:$0xff]  ;;  %v1185_v26 = vadd.f32 %v2324_v11, %v658_v23  ;;  %v1186_v27 = vadd.f32 %v2319_v8, %v659_v24  ;;  %v661_v29 = vld [vmem:[%s2307_s3 + $0xda8] sm:$0xff] }
 0x144   : > { %1671 = vst [vmem:[%s2347_s20 + $0xcd0] sm:$0xff] %v1161_v39  ;;  %1672 = vst [vmem:[%s2347_s20 + $0xcd8] sm:$0xff] %v1162_v40  ;;  %v1187_v28 = vadd.f32 %v2321_v9, %v660_v25  ;;  %v662_v30 = vld [vmem:[%s2307_s3 + $0xdb0] sm:$0xff]  ;;  %v663_v31 = vld [vmem:[%s2307_s3 + $0xdb8] sm:$0xff]  ;;  %v1188_v32 = vadd.f32 %v2324_v11, %v661_v29 }
 0x145   : > { %1673 = vst [vmem:[%s2347_s20 + $0xce0] sm:$0xff] %v1163_v41  ;;  %1674 = vst [vmem:[%s2347_s20 + $0xce8] sm:$0xff] %v1164_v45  ;;  %v1189_v33 = vadd.f32 %v2319_v8, %v662_v30  ;;  %v1190_v34 = vadd.f32 %v2321_v9, %v663_v31  ;;  %v664_v35 = vld [vmem:[%s2307_s3 + $0xdc0] sm:$0xff]  ;;  %v665_v36 = vld [vmem:[%s2307_s3 + $0xdc8] sm:$0xff] }
 0x146   : > { %1675 = vst [vmem:[%s2347_s20 + $0xcf0] sm:$0xff] %v1165_v46  ;;  %1676 = vst [vmem:[%s2347_s20 + $0xcf8] sm:$0xff] %v1166_v47  ;;  %v666_v37 = vld [vmem:[%s2307_s3 + $0xdd0] sm:$0xff]  ;;  %v1191_v38 = vadd.f32 %v2324_v11, %v664_v35  ;;  %v1192_v39 = vadd.f32 %v2319_v8, %v665_v36  ;;  %v667_v41 = vld [vmem:[%s2307_s3 + $0xdd8] sm:$0xff] }
 0x147   : > { %1677 = vst [vmem:[%s2347_s20 + $0xd00] sm:$0xff] %v1167_v51  ;;  %1678 = vst [vmem:[%s2347_s20 + $0xd08] sm:$0xff] %v1168_v52  ;;  %v1193_v40 = vadd.f32 %v2321_v9, %v666_v37  ;;  %v668_v42 = vld [vmem:[%s2307_s3 + $0xde0] sm:$0xff]  ;;  %v669_v43 = vld [vmem:[%s2307_s3 + $0xde8] sm:$0xff]  ;;  %v1194_v44 = vadd.f32 %v2324_v11, %v667_v41 }
 0x148   : > { %1679 = vst [vmem:[%s2347_s20 + $0xd10] sm:$0xff] %v1169_v53  ;;  %1680 = vst [vmem:[%s2347_s20 + $0xd18] sm:$0xff] %v1170_v57  ;;  %v1195_v45 = vadd.f32 %v2319_v8, %v668_v42  ;;  %v1196_v46 = vadd.f32 %v2321_v9, %v669_v43  ;;  %v670_v47 = vld [vmem:[%s2307_s3 + $0xdf0] sm:$0xff]  ;;  %v671_v48 = vld [vmem:[%s2307_s3 + $0xdf8] sm:$0xff] }
 0x149   : > { %1681 = vst [vmem:[%s2347_s20 + $0xd20] sm:$0xff] %v1171_v58  ;;  %1682 = vst [vmem:[%s2347_s20 + $0xd28] sm:$0xff] %v1172_v59  ;;  %v672_v49 = vld [vmem:[%s2307_s3 + $0xe00] sm:$0xff]  ;;  %v1197_v50 = vadd.f32 %v2324_v11, %v670_v47  ;;  %v1198_v51 = vadd.f32 %v2319_v8, %v671_v48  ;;  %v673_v53 = vld [vmem:[%s2307_s3 + $0xe08] sm:$0xff] }
 0x14a   : > { %1683 = vst [vmem:[%s2347_s20 + $0xd30] sm:$0xff] %v1173_v63  ;;  %1684 = vst [vmem:[%s2347_s20 + $0xd38] sm:$0xff] %v1174_v0  ;;  %v1199_v52 = vadd.f32 %v2321_v9, %v672_v49  ;;  %v674_v54 = vld [vmem:[%s2307_s3 + $0xe10] sm:$0xff]  ;;  %v675_v55 = vld [vmem:[%s2307_s3 + $0xe18] sm:$0xff]  ;;  %v1200_v56 = vadd.f32 %v2324_v11, %v673_v53 }
 0x14b   : > { %1685 = vst [vmem:[%s2347_s20 + $0xd40] sm:$0xff] %v1175_v1  ;;  %1686 = vst [vmem:[%s2347_s20 + $0xd48] sm:$0xff] %v1176_v5  ;;  %v1201_v57 = vadd.f32 %v2319_v8, %v674_v54  ;;  %v1202_v58 = vadd.f32 %v2321_v9, %v675_v55  ;;  %v676_v59 = vld [vmem:[%s2307_s3 + $0xe20] sm:$0xff]  ;;  %v677_v60 = vld [vmem:[%s2307_s3 + $0xe28] sm:$0xff] }
 0x14c   : > { %1687 = vst [vmem:[%s2347_s20 + $0xd50] sm:$0xff] %v1177_v6  ;;  %1688 = vst [vmem:[%s2347_s20 + $0xd58] sm:$0xff] %v1178_v7  ;;  %v678_v61 = vld [vmem:[%s2307_s3 + $0xe30] sm:$0xff]  ;;  %v1203_v62 = vadd.f32 %v2324_v11, %v676_v59  ;;  %v1204_v63 = vadd.f32 %v2319_v8, %v677_v60  ;;  %v679_v1 = vld [vmem:[%s2307_s3 + $0xe38] sm:$0xff] }
 0x14d   : > { %1689 = vst [vmem:[%s2347_s20 + $0xd60] sm:$0xff] %v1179_v14  ;;  %1690 = vst [vmem:[%s2347_s20 + $0xd68] sm:$0xff] %v1180_v15  ;;  %v1205_v0 = vadd.f32 %v2321_v9, %v678_v61  ;;  %v680_v2 = vld [vmem:[%s2307_s3 + $0xe40] sm:$0xff]  ;;  %v681_v3 = vld [vmem:[%s2307_s3 + $0xe48] sm:$0xff]  ;;  %v1206_v4 = vadd.f32 %v2324_v11, %v679_v1 }
 0x14e   : > { %1691 = vst [vmem:[%s2347_s20 + $0xd70] sm:$0xff] %v1181_v16  ;;  %1692 = vst [vmem:[%s2347_s20 + $0xd78] sm:$0xff] %v1182_v20  ;;  %v1207_v5 = vadd.f32 %v2319_v8, %v680_v2  ;;  %v1208_v6 = vadd.f32 %v2321_v9, %v681_v3  ;;  %v682_v7 = vld [vmem:[%s2307_s3 + $0xe50] sm:$0xff]  ;;  %v683_v10 = vld [vmem:[%s2307_s3 + $0xe58] sm:$0xff] }
 0x14f   : > { %1693 = vst [vmem:[%s2347_s20 + $0xd80] sm:$0xff] %v1183_v21  ;;  %1694 = vst [vmem:[%s2347_s20 + $0xd88] sm:$0xff] %v1184_v22  ;;  %v684_v12 = vld [vmem:[%s2307_s3 + $0xe60] sm:$0xff]  ;;  %v1209_v13 = vadd.f32 %v2324_v11, %v682_v7  ;;  %v1210_v14 = vadd.f32 %v2319_v8, %v683_v10  ;;  %v685_v16 = vld [vmem:[%s2307_s3 + $0xe68] sm:$0xff] }
 0x150   : > { %1695 = vst [vmem:[%s2347_s20 + $0xd90] sm:$0xff] %v1185_v26  ;;  %1696 = vst [vmem:[%s2347_s20 + $0xd98] sm:$0xff] %v1186_v27  ;;  %v1211_v15 = vadd.f32 %v2321_v9, %v684_v12  ;;  %v686_v17 = vld [vmem:[%s2307_s3 + $0xe70] sm:$0xff]  ;;  %v687_v18 = vld [vmem:[%s2307_s3 + $0xe78] sm:$0xff]  ;;  %v1212_v19 = vadd.f32 %v2324_v11, %v685_v16 }
 0x151   : > { %1697 = vst [vmem:[%s2347_s20 + $0xda0] sm:$0xff] %v1187_v28  ;;  %1698 = vst [vmem:[%s2347_s20 + $0xda8] sm:$0xff] %v1188_v32  ;;  %v1213_v20 = vadd.f32 %v2319_v8, %v686_v17  ;;  %v1214_v21 = vadd.f32 %v2321_v9, %v687_v18  ;;  %v688_v22 = vld [vmem:[%s2307_s3 + $0xe80] sm:$0xff]  ;;  %v689_v23 = vld [vmem:[%s2307_s3 + $0xe88] sm:$0xff] }
 0x152   : > { %1699 = vst [vmem:[%s2347_s20 + $0xdb0] sm:$0xff] %v1189_v33  ;;  %1700 = vst [vmem:[%s2347_s20 + $0xdb8] sm:$0xff] %v1190_v34  ;;  %v690_v24 = vld [vmem:[%s2307_s3 + $0xe90] sm:$0xff]  ;;  %v1215_v25 = vadd.f32 %v2324_v11, %v688_v22  ;;  %v1216_v26 = vadd.f32 %v2319_v8, %v689_v23  ;;  %v691_v28 = vld [vmem:[%s2307_s3 + $0xe98] sm:$0xff] }
 0x153   : > { %1701 = vst [vmem:[%s2347_s20 + $0xdc0] sm:$0xff] %v1191_v38  ;;  %1702 = vst [vmem:[%s2347_s20 + $0xdc8] sm:$0xff] %v1192_v39  ;;  %v1217_v27 = vadd.f32 %v2321_v9, %v690_v24  ;;  %v692_v29 = vld [vmem:[%s2307_s3 + $0xea0] sm:$0xff]  ;;  %v693_v30 = vld [vmem:[%s2307_s3 + $0xea8] sm:$0xff]  ;;  %v1218_v31 = vadd.f32 %v2324_v11, %v691_v28 }
 0x154   : > { %1703 = vst [vmem:[%s2347_s20 + $0xdd0] sm:$0xff] %v1193_v40  ;;  %1704 = vst [vmem:[%s2347_s20 + $0xdd8] sm:$0xff] %v1194_v44  ;;  %v1219_v32 = vadd.f32 %v2319_v8, %v692_v29  ;;  %v1220_v33 = vadd.f32 %v2321_v9, %v693_v30  ;;  %v694_v34 = vld [vmem:[%s2307_s3 + $0xeb0] sm:$0xff]  ;;  %v695_v35 = vld [vmem:[%s2307_s3 + $0xeb8] sm:$0xff] }
 0x155   : > { %1705 = vst [vmem:[%s2347_s20 + $0xde0] sm:$0xff] %v1195_v45  ;;  %1706 = vst [vmem:[%s2347_s20 + $0xde8] sm:$0xff] %v1196_v46  ;;  %v696_v36 = vld [vmem:[%s2307_s3 + $0xec0] sm:$0xff]  ;;  %v1221_v37 = vadd.f32 %v2324_v11, %v694_v34  ;;  %v1222_v38 = vadd.f32 %v2319_v8, %v695_v35  ;;  %v697_v40 = vld [vmem:[%s2307_s3 + $0xec8] sm:$0xff] }
 0x156   : > { %1707 = vst [vmem:[%s2347_s20 + $0xdf0] sm:$0xff] %v1197_v50  ;;  %1708 = vst [vmem:[%s2347_s20 + $0xdf8] sm:$0xff] %v1198_v51  ;;  %v1223_v39 = vadd.f32 %v2321_v9, %v696_v36  ;;  %v698_v41 = vld [vmem:[%s2307_s3 + $0xed0] sm:$0xff]  ;;  %v699_v42 = vld [vmem:[%s2307_s3 + $0xed8] sm:$0xff]  ;;  %v1224_v43 = vadd.f32 %v2324_v11, %v697_v40 }
 0x157   : > { %1709 = vst [vmem:[%s2347_s20 + $0xe00] sm:$0xff] %v1199_v52  ;;  %1710 = vst [vmem:[%s2347_s20 + $0xe08] sm:$0xff] %v1200_v56  ;;  %v1225_v44 = vadd.f32 %v2319_v8, %v698_v41  ;;  %v1226_v45 = vadd.f32 %v2321_v9, %v699_v42  ;;  %v700_v46 = vld [vmem:[%s2307_s3 + $0xee0] sm:$0xff]  ;;  %v701_v47 = vld [vmem:[%s2307_s3 + $0xee8] sm:$0xff] }
 0x158   : > { %1711 = vst [vmem:[%s2347_s20 + $0xe10] sm:$0xff] %v1201_v57  ;;  %1712 = vst [vmem:[%s2347_s20 + $0xe18] sm:$0xff] %v1202_v58  ;;  %v702_v48 = vld [vmem:[%s2307_s3 + $0xef0] sm:$0xff]  ;;  %v1227_v49 = vadd.f32 %v2324_v11, %v700_v46  ;;  %v1228_v50 = vadd.f32 %v2319_v8, %v701_v47  ;;  %v703_v52 = vld [vmem:[%s2307_s3 + $0xef8] sm:$0xff] }
 0x159   : > { %1713 = vst [vmem:[%s2347_s20 + $0xe20] sm:$0xff] %v1203_v62  ;;  %1714 = vst [vmem:[%s2347_s20 + $0xe28] sm:$0xff] %v1204_v63  ;;  %v1229_v51 = vadd.f32 %v2321_v9, %v702_v48  ;;  %v704_v53 = vld [vmem:[%s2307_s3 + $0xf00] sm:$0xff]  ;;  %v705_v54 = vld [vmem:[%s2307_s3 + $0xf08] sm:$0xff]  ;;  %v1230_v55 = vadd.f32 %v2324_v11, %v703_v52 }
 0x15a   : > { %1715 = vst [vmem:[%s2347_s20 + $0xe30] sm:$0xff] %v1205_v0  ;;  %1716 = vst [vmem:[%s2347_s20 + $0xe38] sm:$0xff] %v1206_v4  ;;  %v1231_v56 = vadd.f32 %v2319_v8, %v704_v53  ;;  %v1232_v57 = vadd.f32 %v2321_v9, %v705_v54  ;;  %v706_v58 = vld [vmem:[%s2307_s3 + $0xf10] sm:$0xff]  ;;  %v707_v59 = vld [vmem:[%s2307_s3 + $0xf18] sm:$0xff] }
 0x15b   : > { %1717 = vst [vmem:[%s2347_s20 + $0xe40] sm:$0xff] %v1207_v5  ;;  %1718 = vst [vmem:[%s2347_s20 + $0xe48] sm:$0xff] %v1208_v6  ;;  %v708_v60 = vld [vmem:[%s2307_s3 + $0xf20] sm:$0xff]  ;;  %v1233_v61 = vadd.f32 %v2324_v11, %v706_v58  ;;  %v1234_v62 = vadd.f32 %v2319_v8, %v707_v59  ;;  %v709_v0 = vld [vmem:[%s2307_s3 + $0xf28] sm:$0xff] }
 0x15c   : > { %1719 = vst [vmem:[%s2347_s20 + $0xe50] sm:$0xff] %v1209_v13  ;;  %1720 = vst [vmem:[%s2347_s20 + $0xe58] sm:$0xff] %v1210_v14  ;;  %v1235_v63 = vadd.f32 %v2321_v9, %v708_v60  ;;  %v710_v1 = vld [vmem:[%s2307_s3 + $0xf30] sm:$0xff]  ;;  %v711_v2 = vld [vmem:[%s2307_s3 + $0xf38] sm:$0xff]  ;;  %v1236_v3 = vadd.f32 %v2324_v11, %v709_v0 }
 0x15d   : > { %1721 = vst [vmem:[%s2347_s20 + $0xe60] sm:$0xff] %v1211_v15  ;;  %1722 = vst [vmem:[%s2347_s20 + $0xe68] sm:$0xff] %v1212_v19  ;;  %v1237_v4 = vadd.f32 %v2319_v8, %v710_v1  ;;  %v1238_v5 = vadd.f32 %v2321_v9, %v711_v2  ;;  %v712_v6 = vld [vmem:[%s2307_s3 + $0xf40] sm:$0xff]  ;;  %v713_v7 = vld [vmem:[%s2307_s3 + $0xf48] sm:$0xff] }
 0x15e   : > { %1723 = vst [vmem:[%s2347_s20 + $0xe70] sm:$0xff] %v1213_v20  ;;  %1724 = vst [vmem:[%s2347_s20 + $0xe78] sm:$0xff] %v1214_v21  ;;  %v714_v10 = vld [vmem:[%s2307_s3 + $0xf50] sm:$0xff]  ;;  %v1239_v12 = vadd.f32 %v2324_v11, %v712_v6  ;;  %v1240_v13 = vadd.f32 %v2319_v8, %v713_v7  ;;  %v715_v15 = vld [vmem:[%s2307_s3 + $0xf58] sm:$0xff] }
 0x15f   : > { %1725 = vst [vmem:[%s2347_s20 + $0xe80] sm:$0xff] %v1215_v25  ;;  %1726 = vst [vmem:[%s2347_s20 + $0xe88] sm:$0xff] %v1216_v26  ;;  %v1241_v14 = vadd.f32 %v2321_v9, %v714_v10  ;;  %v716_v16 = vld [vmem:[%s2307_s3 + $0xf60] sm:$0xff]  ;;  %v717_v17 = vld [vmem:[%s2307_s3 + $0xf68] sm:$0xff]  ;;  %v1242_v18 = vadd.f32 %v2324_v11, %v715_v15 }
 0x160   : > { %1727 = vst [vmem:[%s2347_s20 + $0xe90] sm:$0xff] %v1217_v27  ;;  %1728 = vst [vmem:[%s2347_s20 + $0xe98] sm:$0xff] %v1218_v31  ;;  %v1243_v19 = vadd.f32 %v2319_v8, %v716_v16  ;;  %v1244_v20 = vadd.f32 %v2321_v9, %v717_v17  ;;  %v718_v21 = vld [vmem:[%s2307_s3 + $0xf70] sm:$0xff]  ;;  %v719_v22 = vld [vmem:[%s2307_s3 + $0xf78] sm:$0xff] }
 0x161   : > { %1729 = vst [vmem:[%s2347_s20 + $0xea0] sm:$0xff] %v1219_v32  ;;  %1730 = vst [vmem:[%s2347_s20 + $0xea8] sm:$0xff] %v1220_v33  ;;  %v720_v23 = vld [vmem:[%s2307_s3 + $0xf80] sm:$0xff]  ;;  %v1245_v24 = vadd.f32 %v2324_v11, %v718_v21  ;;  %v1246_v25 = vadd.f32 %v2319_v8, %v719_v22  ;;  %v721_v27 = vld [vmem:[%s2307_s3 + $0xf88] sm:$0xff] }
 0x162   : > { %1731 = vst [vmem:[%s2347_s20 + $0xeb0] sm:$0xff] %v1221_v37  ;;  %1732 = vst [vmem:[%s2347_s20 + $0xeb8] sm:$0xff] %v1222_v38  ;;  %v1247_v26 = vadd.f32 %v2321_v9, %v720_v23  ;;  %v722_v28 = vld [vmem:[%s2307_s3 + $0xf90] sm:$0xff]  ;;  %v723_v29 = vld [vmem:[%s2307_s3 + $0xf98] sm:$0xff]  ;;  %v1248_v30 = vadd.f32 %v2324_v11, %v721_v27 }
 0x163   : > { %1733 = vst [vmem:[%s2347_s20 + $0xec0] sm:$0xff] %v1223_v39  ;;  %1734 = vst [vmem:[%s2347_s20 + $0xec8] sm:$0xff] %v1224_v43  ;;  %v1249_v31 = vadd.f32 %v2319_v8, %v722_v28  ;;  %v1250_v32 = vadd.f32 %v2321_v9, %v723_v29  ;;  %v724_v33 = vld [vmem:[%s2307_s3 + $0xfa0] sm:$0xff]  ;;  %v725_v34 = vld [vmem:[%s2307_s3 + $0xfa8] sm:$0xff] }
 0x164   : > { %1735 = vst [vmem:[%s2347_s20 + $0xed0] sm:$0xff] %v1225_v44  ;;  %1736 = vst [vmem:[%s2347_s20 + $0xed8] sm:$0xff] %v1226_v45  ;;  %v726_v35 = vld [vmem:[%s2307_s3 + $0xfb0] sm:$0xff]  ;;  %v1251_v36 = vadd.f32 %v2324_v11, %v724_v33  ;;  %v1252_v37 = vadd.f32 %v2319_v8, %v725_v34  ;;  %v727_v39 = vld [vmem:[%s2307_s3 + $0xfb8] sm:$0xff] }
 0x165   : > { %1737 = vst [vmem:[%s2347_s20 + $0xee0] sm:$0xff] %v1227_v49  ;;  %1738 = vst [vmem:[%s2347_s20 + $0xee8] sm:$0xff] %v1228_v50  ;;  %v1253_v38 = vadd.f32 %v2321_v9, %v726_v35  ;;  %v728_v40 = vld [vmem:[%s2307_s3 + $0xfc0] sm:$0xff]  ;;  %v729_v41 = vld [vmem:[%s2307_s3 + $0xfc8] sm:$0xff]  ;;  %v1254_v42 = vadd.f32 %v2324_v11, %v727_v39 }
 0x166   : > { %1739 = vst [vmem:[%s2347_s20 + $0xef0] sm:$0xff] %v1229_v51  ;;  %1740 = vst [vmem:[%s2347_s20 + $0xef8] sm:$0xff] %v1230_v55  ;;  %v1255_v43 = vadd.f32 %v2319_v8, %v728_v40  ;;  %v1256_v44 = vadd.f32 %v2321_v9, %v729_v41  ;;  %v730_v45 = vld [vmem:[%s2307_s3 + $0xfd0] sm:$0xff]  ;;  %v731_v46 = vld [vmem:[%s2307_s3 + $0xfd8] sm:$0xff] }
 0x167   : > { %1741 = vst [vmem:[%s2347_s20 + $0xf00] sm:$0xff] %v1231_v56  ;;  %1742 = vst [vmem:[%s2347_s20 + $0xf08] sm:$0xff] %v1232_v57  ;;  %v732_v47 = vld [vmem:[%s2307_s3 + $0xfe0] sm:$0xff]  ;;  %v1257_v48 = vadd.f32 %v2324_v11, %v730_v45  ;;  %v1258_v49 = vadd.f32 %v2319_v8, %v731_v46  ;;  %v733_v51 = vld [vmem:[%s2307_s3 + $0xfe8] sm:$0xff] }
 0x168   : > { %1743 = vst [vmem:[%s2347_s20 + $0xf10] sm:$0xff] %v1233_v61  ;;  %1744 = vst [vmem:[%s2347_s20 + $0xf18] sm:$0xff] %v1234_v62  ;;  %v1259_v50 = vadd.f32 %v2321_v9, %v732_v47  ;;  %v1260_v52 = vadd.f32 %v2324_v11, %v733_v51 }
 0x169   : > { %1745 = vst [vmem:[%s2347_s20 + $0xf20] sm:$0xff] %v1235_v63  ;;  %1746 = vst [vmem:[%s2347_s20 + $0xf28] sm:$0xff] %v1236_v3 }
 0x16a   : > { %1747 = vst [vmem:[%s2347_s20 + $0xf30] sm:$0xff] %v1237_v4  ;;  %1748 = vst [vmem:[%s2347_s20 + $0xf38] sm:$0xff] %v1238_v5 }
 0x16b   : > { %1749 = vst [vmem:[%s2347_s20 + $0xf40] sm:$0xff] %v1239_v12  ;;  %1750 = vst [vmem:[%s2347_s20 + $0xf48] sm:$0xff] %v1240_v13 }
 0x16c   : > { %1751 = vst [vmem:[%s2347_s20 + $0xf50] sm:$0xff] %v1241_v14  ;;  %1752 = vst [vmem:[%s2347_s20 + $0xf58] sm:$0xff] %v1242_v18 }
 0x16d   : > { %1753 = vst [vmem:[%s2347_s20 + $0xf60] sm:$0xff] %v1243_v19  ;;  %1754 = vst [vmem:[%s2347_s20 + $0xf68] sm:$0xff] %v1244_v20 }
 0x16e   : > { %1755 = vst [vmem:[%s2347_s20 + $0xf70] sm:$0xff] %v1245_v24  ;;  %1756 = vst [vmem:[%s2347_s20 + $0xf78] sm:$0xff] %v1246_v25 }
 0x16f   : > { %1757 = vst [vmem:[%s2347_s20 + $0xf80] sm:$0xff] %v1247_v26  ;;  %1758 = vst [vmem:[%s2347_s20 + $0xf88] sm:$0xff] %v1248_v30  ;;  %1778 = sbr.rel (!%p3942_p6) target bundleno = 403 (0x193), region = 40 }
 0x170   : > { %1759 = vst [vmem:[%s2347_s20 + $0xf90] sm:$0xff] %v1249_v31  ;;  %1760 = vst [vmem:[%s2347_s20 + $0xf98] sm:$0xff] %v1250_v32 }
 0x171   : > { %1761 = vst [vmem:[%s2347_s20 + $0xfa0] sm:$0xff] %v1251_v36  ;;  %1762 = vst [vmem:[%s2347_s20 + $0xfa8] sm:$0xff] %v1252_v37 }
 0x172   : > { %1763 = vst [vmem:[%s2347_s20 + $0xfb0] sm:$0xff] %v1253_v38  ;;  %1764 = vst [vmem:[%s2347_s20 + $0xfb8] sm:$0xff] %v1254_v42 }
 0x173   : > { %1765 = vst [vmem:[%s2347_s20 + $0xfc0] sm:$0xff] %v1255_v43  ;;  %1766 = vst [vmem:[%s2347_s20 + $0xfc8] sm:$0xff] %v1256_v44 }
 0x174   : > { %1767 = vst [vmem:[%s2347_s20 + $0xfd0] sm:$0xff] %v1257_v48  ;;  %1768 = vst [vmem:[%s2347_s20 + $0xfd8] sm:$0xff] %v1258_v49 }
 0x175   : > { %1769 = vst [vmem:[%s2347_s20 + $0xfe0] sm:$0xff] %v1259_v50  ;;  %1770 = vst [vmem:[%s2347_s20 + $0xfe8] sm:$0xff] %v1260_v52 }
 0x176   : > { %s3954_s5 = smov (!%p1782_p10, %s1781_s5), 170 }
 0x177   : > { %s3861_s6 = smul.u32 384, %s3954_s5 }
 0x179   : > { %s1787_s7 = ssub.s32 65280, %s3861_s6 }
 0x17a   : > { %1788 = vsyncadd %s1772_s22, %s1787_s7  ;;  %p1908_p12 = scmp.ne.s32.totalorder %s3861_s6, 0  ;;  %s1934_s23 = smul.u32 65280, %s2123_s12 }
 0x17b   : > { %s1795_s16 = sshll.u32 %s2347_s20, 4  ;;  %s2137_s8 = smov [#allocation7]   ;;  %s3874_s16 = int_to_ptr.vmem [resolvable:$true] %s1795_s16 }
 0x17c   : > { %s3872_s28 = scalar_lea.hbm %s3926_s2, %s1934_s23  ;;  %s2045_s19 = scalar_lea.vmem %s3874_s16, %s3861_s6 }
 0x17d   : > { %p2046_p13 = scmp.ne.s32.totalorder %s3874_s16, %s2045_s19  ;;  %s2049_s15 = sshll.u32 %s2137_s8, 4  ;;  %s2050_s15 = int_to_ptr.vmem [resolvable:$false] %s2049_s15 }
 0x17e   : > { %s2051_s12 = scalar_lea.vmem %s2050_s15, 130560  ;;  %p2052_p7 = scmp.lt.s32.totalorder %s3874_s16, %s2050_s15 }
 0x17f   : > { %p2047_p1 = pnand %p2046_p13, %p1908_p12  ;;  %p2053_p5 = scmp.lt.s32.totalorder %s2051_s12, %s2045_s19 }
 0x181   : > { %p2048_p3 = pneg %p2047_p1  ;;  %p2054_p8 = por %p2053_p5, %p2052_p7 }
 0x183   : > { %p2055_p9 = pnand %p2054_p8, %p2048_p3 }
 0x185   : > { %2058 = shalt.err (!%p2055_p9)
}
 0x186   : > { %s2059_s18 = scalar_lea.hbm %s3872_s28, %s3861_s6  ;;  %s2063_s3 = scalar_lea.hbm %s3926_s2, 196992 }
 0x187   : > { %p2060_p0 = scmp.ne.s32.totalorder %s3872_s28, %s2059_s18  ;;  %p2064_p4 = scmp.lt.u32.totalorder %s3872_s28, %s3926_s2 }
 0x188   : > { %p2065_p6 = scmp.lt.u32.totalorder %s2063_s3, %s2059_s18  ;;  %p2067_p13 = scmp.lt.u32.totalorder %s2059_s18, %s3872_s28 }
 0x189   : > { %p2061_p11 = pnand %p2060_p0, %p1908_p12 }
 0x18a   : > { %p2066_p10 = por %p2065_p6, %p2064_p4 }
 0x18b   : > { %p2062_p2 = pneg %p2061_p11 }
 0x18c   : > { %p2068_p1 = por %p2067_p13, %p2066_p10 }
 0x18e   : > { %p2069_p3 = pnand %p2068_p1, %p2062_p2 }
 0x190   : > { %2072 = shalt.err (!%p2069_p3)
}
 0x191   : > { %s2138_s5 = smov 384   ;;  %s2139_s7 = smov 24  }
 0x192   : > { %1801 = dma.vmem_to_hbm [thread:$0]  (%p1908_p12), %s3874_s16, %s3861_s6, %s3872_s28, %s1772_s22, %s2138_s5, %s2138_s5, %s2139_s7  }
 0x193 PF: > { %p1935_p7 = scmp.ge.s32.totalorder %s2131_s14, 2  ;;  %s1810_s23 = sand.u32 1, %s2111_s9  }
 0x194   : > { %p3943_p5 = scmp.ne.s32.totalorder %s3935_s25, 0  ;;  %s1811_s4 = scalar_lea.sflag [#allocation4], %s1810_s23 }
 0x196   : > { %p1928_p8 = pnand %p1935_p7, %p3943_p5 }
 0x198   : > { %2106 = dma.done.wait (!%p1928_p8), %s1811_s4, 65280  }
 0x199   : > { %2108 = vsyncadd (!%p1928_p8), %s1811_s4, 4294902016  ;;  %s19_s14 = sadd.s32 1, %s2131_s14   ;;  %s3944_s9 = smov %s2115_s10 }
 0x19a   : > { %p16_p9 = scmp.ge.s32.totalorder %s19_s14, 6   ;;  %s3945_s10 = smov %s2119_s11 }
 0x19b   : > { %s3946_s11 = smov %s2217_s24  ;;  %s3947_s12 = smov %s2127_s13 }
 0x19c   : > { %s3948_s13 = smov %s3950_s17  ;;  %18 = sbr.rel (!%p16_p9) target bundleno = 7 (0x7), region = 78 }
 0x1a3   :  { %1816 = vsyncpa [#allocation3], 1 }
 0x1a4   :  { %1818 = vsyncpa [#allocation3 + $0x1], 1 }
 0x1a5   :  { %1819 = vsyncpa [#allocation6], 1 }
 0x1a6   :  { %1820 = vsyncpa [#allocation4], 1 }
 0x1a7   :  { %1822 = vsyncpa [#allocation4 + $0x1], 1 }

</bundles_post_ra>
